<compile_context>
chip_gen: v6e
topology: v6e:2x2x1
jax: 0.10.0
libtpu: 0.0.40
codegen_flags: <defaults>
</compile_context>

<pallas_src>
import math
import numpy as np
import jax
import jax.numpy as jnp
from jax.experimental import pallas as pl
from jax.experimental.pallas import tpu as pltpu


# ------------------------------------------------------------------------
# Deterministic parameter construction (host-side numpy glue)
# ------------------------------------------------------------------------
def _klein_F(t1, t2, X, Y):
    U = math.cos(t1) * X + math.sin(t1) * Y
    return math.sin(t2) * U + math.cos(t2) * (2.0 * U * U - 1.0)


def klein_filter_generator(in_channels, out_channels, kernel_size, nquad=32):
    """Midpoint-rule replacement for scipy dblquad; deterministic."""
    size = 2 * kernel_size + 1
    filt = np.zeros((out_channels, in_channels, size, size), dtype=np.float64)
    d_size = int(math.floor(math.sqrt(out_channels)))
    for i in range(d_size):
        for k in range(d_size):
            t1 = math.pi * (i / d_size)
            t2 = math.pi * (k / d_size)
            for n in range(size):
                for m in range(size):
                    x0, x1 = -1 + 2 * n / size, -1 + 2 * (n + 1) / size
                    y0, y1 = -1 + 2 * m / size, -1 + 2 * (m + 1) / size
                    xs = x0 + (np.arange(nquad) + 0.5) * (x1 - x0) / nquad
                    ys = y0 + (np.arange(nquad) + 0.5) * (y1 - y0) / nquad
                    X, Y = np.meshgrid(xs, ys, indexing="ij")
                    val = _klein_F(t1, t2, X, Y).mean() * (x1 - x0) * (y1 - y0)
                    filt[i * d_size + k, :, n, m] = val
    return filt


def _klein_metric(t1, t2, m1, m2, nquad=64):
    xs = -1.0 + (np.arange(nquad) + 0.5) * 2.0 / nquad
    X, Y = np.meshgrid(xs, xs, indexing="ij")
    diff = _klein_F(t1, t2, X, Y) - _klein_F(m1, m2, X, Y)
    return math.sqrt((diff * diff).mean() * 4.0)


def klein_prune_mask(out_channels, in_channels, kh, kw, threshold):
    mask = np.ones((out_channels, in_channels, kh, kw), dtype=np.float64)
    d1 = int(math.floor(math.sqrt(in_channels)))
    d2 = int(math.floor(math.sqrt(out_channels)))
    for i in range(d1):
        for k in range(d1):
            for a in range(d2):
                for b in range(d2):
                    t1, t2 = math.pi * i / d1, math.pi * k / d1
                    m1, m2 = math.pi * a / d2, math.pi * b / d2
                    if _klein_metric(t1, t2, m1, m2) > threshold:
                        mask[a * d2 + b, i * d1 + k, :, :] = 0.0
    return mask


# ------------------------------------------------------------------------
# One-time packing of parameters / index constants (outside the kernel)
# ------------------------------------------------------------------------
def _pack_conv_weight(w_oihw, N):
    """(Cout,Cin,3,3) -> (3*Cout*N, 3*Cin*N) block matrix for the fused kw matmul.

    row = (kh*Cout + co)*N + n, col = (kw*Cin + ci)*N + n (zero off the batch diag).
    """
    w = jnp.asarray(w_oihw, jnp.float32)
    cout, cin = int(w.shape[0]), int(w.shape[1])
    blk = jnp.transpose(w, (2, 0, 3, 1)).reshape(3 * cout, 3 * cin)
    return jnp.kron(blk, jnp.eye(N, dtype=jnp.float32))


def _spatial_consts(H, W):
    """Host-precomputed masks / matrices for one stage (per-image lane layout)."""
    HW = H * W
    m = np.arange(HW)
    w = m % W
    h = m // W
    wlast = (w == W - 1).astype(np.float32)[None, :]          # (1, HW)
    wfirst = (w == 0).astype(np.float32)[None, :]             # (1, HW)
    phase = np.zeros((4, HW), np.float32)                     # p = 2*(h%2) + (w%2)
    phase[2 * (h % 2) + (w % 2), m] = 1.0
    Ho, Wo = H // 2, W // 2
    pool = np.zeros((HW, Ho * Wo), np.float32)                # per-image 2x2 block sum
    pool[m, (h // 2) * Wo + (w // 2)] = 1.0
    return (jnp.asarray(wlast), jnp.asarray(wfirst),
            jnp.asarray(phase), jnp.asarray(np.ascontiguousarray(phase.T)),
            jnp.asarray(pool))


# ------------------------------------------------------------------------
# Fused Pallas kernel
# ------------------------------------------------------------------------
def _stage(x, wmat, gamma, beta, wlast, wfirst, phase, phase_t, pool,
           bsum, nsum, tri4, *, N, H, W, cout):
    """[circular 3x3 conv -> BN(train) -> LeakyReLU(0.1) -> LPS down2].

    x      : (Cin*N, HW)  rows r = ci*N + n, lanes m = h*W + w (per image)
    wmat   : (3*Cout*N, 3*Cin*N) fused conv weight (kw/ci contraction)
    gamma  : (Cout*N, 1)   beta : (Cout*N, 1)   (per-channel, repeated over n)
    wlast/wfirst : (1, HW) w-boundary masks;  phase : (4, HW);  phase_t : (HW, 4)
    pool   : (HW, HW//4) per-image 2x2 block-sum (compaction) matrix
    bsum   : (Cout*N, Cout*N) channel-sum broadcast;  nsum : sample-sum broadcast
    tri4   : (4, 4) strict upper-triangular ones (first-max tie break)
    returns (Cout*N, HW//4)
    """
    HW = H * W
    CR = cout * N
    f32 = jnp.float32

    def shift_w(v, dw):
        # result[r, (h,w)] = v[r, (h, (w+dw) mod W)] ; fix only at the w boundary.
        main = pltpu.roll(v, (-dw) % HW, axis=1)
        fix = pltpu.roll(v, (dw * (W - 1)) % HW, axis=1)
        bad = wlast if dw > 0 else wfirst
        return jnp.where(bad > 0.0, fix, main)

    def shift_h(v, dh):
        # result[r, (h,w)] = v[r, ((h+dh) mod H, w)] ; per-image lanes wrap exactly.
        return pltpu.roll(v, (-dh * W) % HW, axis=1)

    # --- circular 3x3 conv: one fused MXU matmul over (kw, ci), kh via rolls ---
    rhs = jnp.concatenate([shift_w(x, -1), x, shift_w(x, 1)], axis=0)   # (3*Cin*N, HW)
    part = jnp.dot(wmat, rhs, preferred_element_type=f32)               # (3*CR, HW)
    conv = (shift_h(part[0:CR, :], -1)
            + part[CR:2 * CR, :]
            + shift_h(part[2 * CR:3 * CR, :], 1))                       # (CR, HW)
    # Conv bias omitted: exactly cancelled by train-mode BN mean subtraction.

    # --- BatchNorm2d (train mode, biased batch stats) + LeakyReLU(0.1) --------
    inv_cnt = 1.0 / float(N * HW)
    mean = jnp.sum(jnp.dot(bsum, conv, preferred_element_type=f32),
                   axis=1, keepdims=True) * inv_cnt                     # (CR, 1)
    cent = conv - mean
    var = jnp.sum(jnp.dot(bsum, cent * cent, preferred_element_type=f32),
                  axis=1, keepdims=True) * inv_cnt                      # (CR, 1)
    y = cent * (gamma * jax.lax.rsqrt(var + 1e-5)) + beta
    y = jnp.where(y > 0, y, 0.1 * y)

    # --- LPS polyphase down2 ---------------------------------------------------
    # TODO(synk): the learned logits net (get_logits_model('LPSLogitLayers')) is
    # not part of the provided source; logits = per-sample squared L2 norm of
    # each polyphase component, hard argmax selection (first max wins).
    plogit = jnp.dot(y * y, phase_t, preferred_element_type=f32)        # (CR, 4) per row
    logits = jnp.dot(nsum, plogit, preferred_element_type=f32)          # (CR, 4) per sample
    is_max = (logits >= jnp.max(logits, axis=1, keepdims=True)).astype(f32)
    no_earlier = jnp.dot(is_max, tri4, preferred_element_type=f32) < 0.5
    onehot = jnp.where(no_earlier, is_max, 0.0)                         # (CR, 4)
    keep = jnp.dot(onehot, phase, preferred_element_type=f32)           # (CR, HW)
    # Compact (h, w) -> (h//2, w//2): per-image 2x2 block-sum matrix; only the
    # selected phase of each 2x2 block is nonzero, so this is a pure selection.
    return jnp.dot(y * keep, pool, preferred_element_type=f32)          # (CR, HW//4)


def _make_kernel(N, H, W, cout):
    def kernel(x_ref, bsum_ref, nsum_ref, tri_ref,
               w1_ref, g1_ref, b1_ref, wl1_ref, wf1_ref, ph1_ref, pt1_ref, pool1_ref,
               w2_ref, g2_ref, b2_ref, wl2_ref, wf2_ref, ph2_ref, pt2_ref, pool2_ref,
               o_ref):
        bsum, nsum, tri4 = bsum_ref[...], nsum_ref[...], tri_ref[...]
        y1 = _stage(x_ref[...], w1_ref[...], g1_ref[...], b1_ref[...],
                    wl1_ref[...], wf1_ref[...], ph1_ref[...], pt1_ref[...],
                    pool1_ref[...], bsum, nsum, tri4,
                    N=N, H=H, W=W, cout=cout)
        y2 = _stage(y1, w2_ref[...], g2_ref[...], b2_ref[...],
                    wl2_ref[...], wf2_ref[...], ph2_ref[...], pt2_ref[...],
                    pool2_ref[...], bsum, nsum, tri4,
                    N=N, H=H // 2, W=W // 2, cout=cout)
        o_ref[...] = y2
    return kernel


def _vmem():
    return pl.BlockSpec(memory_space=pltpu.MemorySpace.VMEM)


# ------------------------------------------------------------------------
# Public wrapper (boundary glue: NCHW <-> sublane-packed (C*N, H*W))
# ------------------------------------------------------------------------
def klein_one_layer_forward(x_nchw, params):
    N, Cin, H, W = x_nchw.shape
    Cout = int(params["gamma1"].shape[0])
    assert H % 4 == 0 and W % 4 == 0, "two LPS down2 stages need H, W % 4 == 0"
    Hq, Wq = H // 4, W // 4
    f32 = jnp.float32

    # Rows = c*N + n (fills the 8 vreg sublanes for C=4, N=2), lanes = h*W + w.
    x_cm = jnp.transpose(x_nchw.astype(f32), (1, 0, 2, 3)).reshape(Cin * N, H * W)

    # One-time parameter / constant packing (tiny; outside the kernel).
    w1 = _pack_conv_weight(params["w1"], N)
    w2 = _pack_conv_weight(params["w2"], N)
    g1 = jnp.repeat(params["gamma1"].astype(f32), N).reshape(Cout * N, 1)
    b1 = jnp.repeat(params["beta1"].astype(f32), N).reshape(Cout * N, 1)
    g2 = jnp.repeat(params["gamma2"].astype(f32), N).reshape(Cout * N, 1)
    b2 = jnp.repeat(params["beta2"].astype(f32), N).reshape(Cout * N, 1)
    bsum = jnp.asarray(np.kron(np.eye(Cout), np.ones((N, N))), f32)      # channel sum
    nsum = jnp.asarray(np.kron(np.ones((Cout, Cout)), np.eye(N)), f32)   # sample sum
    tri4 = jnp.asarray(np.triu(np.ones((4, 4)), 1), f32)                 # strict prefix
    wl1, wf1, ph1, pt1, pool1 = _spatial_consts(H, W)
    wl2, wf2, ph2, pt2, pool2 = _spatial_consts(H // 2, W // 2)

    out = pl.pallas_call(
        _make_kernel(N, H, W, Cout),
        out_shape=jax.ShapeDtypeStruct((Cout * N, Hq * Wq), f32),
        in_specs=[_vmem()] * 20,
        out_specs=_vmem(),
    )(x_cm, bsum, nsum, tri4,
      w1, g1, b1, wl1, wf1, ph1, pt1, pool1,
      w2, g2, b2, wl2, wf2, ph2, pt2, pool2)

    return jnp.transpose(out.reshape(Cout, N, Hq, Wq), (1, 0, 2, 3))     # -> NCHW


def init_params(threshold, in_channels, out_channels, kernel_size, key):
    # TODO(synk): kernel is specialized to the 3x3 / padding=1 circular case
    # (kernel_size=1 in the reference constructor).
    assert kernel_size == 1, "kernel specialized to 3x3 circular conv"

    # Klein filters (fixed, deterministic) for the first conv.
    w1 = jnp.asarray(klein_filter_generator(in_channels, out_channels, kernel_size),
                     jnp.float32)

    # Klein-pruned random conv for the second stage (w = w_orig * mask).
    k_w2, _ = jax.random.split(key)
    fan2 = out_channels * 9
    w2 = jax.random.uniform(k_w2, (out_channels, out_channels, 3, 3), jnp.float32,
                            -1.0 / math.sqrt(fan2), 1.0 / math.sqrt(fan2))
    mask = jnp.asarray(klein_prune_mask(out_channels, out_channels, 3, 3, threshold),
                       jnp.float32)
    w2 = w2 * mask

    # Conv biases omitted: train-mode BatchNorm subtracts the batch mean of
    # (conv + bias), so the biases cancel exactly in the forward output.
    ones = jnp.ones((out_channels,), jnp.float32)
    zeros = jnp.zeros((out_channels,), jnp.float32)
    return dict(w1=w1, w2=w2, gamma1=ones, beta1=zeros, gamma2=ones, beta2=zeros)


if __name__ == "__main__":
    # KleinOneLayer(threshold=1.5, in_channels=4, out_channels=4,
    #               kernel_size=1, padding=1)
    threshold, in_ch, out_ch, ksz = 1.5, 4, 4, 1
    key = jax.random.PRNGKey(0)
    k_x, k_p = jax.random.split(key)

    params = init_params(threshold, in_ch, out_ch, ksz, k_p)
    x = jax.random.normal(k_x, (2, in_ch, 32, 32), jnp.float32)   # NCHW

    y = klein_one_layer_forward(x, params)
    y = jax.block_until_ready(y)
    assert y.shape == (2, out_ch, 8, 8), y.shape
    assert bool(jnp.all(jnp.isfinite(y)))
    print("KERNEL_OK")
</pallas_src>

<mosaic_0001>
module attributes {stable_mosaic.version = 11 : i64} {
  func.func @kernel(%arg0: memref<8x1024xf32, #tpu.memory_space<vmem>>, %arg1: memref<8x8xf32, #tpu.memory_space<vmem>>, %arg2: memref<8x8xf32, #tpu.memory_space<vmem>>, %arg3: memref<4x4xf32, #tpu.memory_space<vmem>>, %arg4: memref<24x24xf32, #tpu.memory_space<vmem>>, %arg5: memref<8x1xf32, #tpu.memory_space<vmem>>, %arg6: memref<8x1xf32, #tpu.memory_space<vmem>>, %arg7: memref<1x1024xf32, #tpu.memory_space<vmem>>, %arg8: memref<1x1024xf32, #tpu.memory_space<vmem>>, %arg9: memref<4x1024xf32, #tpu.memory_space<vmem>>, %arg10: memref<1024x4xf32, #tpu.memory_space<vmem>>, %arg11: memref<1024x256xf32, #tpu.memory_space<vmem>>, %arg12: memref<24x24xf32, #tpu.memory_space<vmem>>, %arg13: memref<8x1xf32, #tpu.memory_space<vmem>>, %arg14: memref<8x1xf32, #tpu.memory_space<vmem>>, %arg15: memref<1x256xf32, #tpu.memory_space<vmem>>, %arg16: memref<1x256xf32, #tpu.memory_space<vmem>>, %arg17: memref<4x256xf32, #tpu.memory_space<vmem>>, %arg18: memref<256x4xf32, #tpu.memory_space<vmem>>, %arg19: memref<256x64xf32, #tpu.memory_space<vmem>>, %arg20: memref<8x64xf32, #tpu.memory_space<vmem>>) attributes {dimension_semantics = [], scalar_prefetch = 0 : i64, scratch_operands = 0 : i64, tpu.core_type = #tpu.core_type<tc>} {
    %c0 = arith.constant 0 : index
    %c0_0 = arith.constant 0 : index
    %0 = vector.load %arg1[%c0, %c0_0] : memref<8x8xf32, #tpu.memory_space<vmem>>, vector<8x8xf32>
    %c0_1 = arith.constant 0 : index
    %c0_2 = arith.constant 0 : index
    %1 = vector.load %arg2[%c0_1, %c0_2] : memref<8x8xf32, #tpu.memory_space<vmem>>, vector<8x8xf32>
    %c0_3 = arith.constant 0 : index
    %c0_4 = arith.constant 0 : index
    %2 = vector.load %arg3[%c0_3, %c0_4] : memref<4x4xf32, #tpu.memory_space<vmem>>, vector<4x4xf32>
    %c0_5 = arith.constant 0 : index
    %c0_6 = arith.constant 0 : index
    %3 = vector.load %arg0[%c0_5, %c0_6] : memref<8x1024xf32, #tpu.memory_space<vmem>>, vector<8x1024xf32>
    %c0_7 = arith.constant 0 : index
    %c0_8 = arith.constant 0 : index
    %4 = vector.load %arg4[%c0_7, %c0_8] : memref<24x24xf32, #tpu.memory_space<vmem>>, vector<24x24xf32>
    %c0_9 = arith.constant 0 : index
    %c0_10 = arith.constant 0 : index
    %5 = vector.load %arg5[%c0_9, %c0_10] : memref<8x1xf32, #tpu.memory_space<vmem>>, vector<8x1xf32>
    %c0_11 = arith.constant 0 : index
    %c0_12 = arith.constant 0 : index
    %6 = vector.load %arg6[%c0_11, %c0_12] : memref<8x1xf32, #tpu.memory_space<vmem>>, vector<8x1xf32>
    %c0_13 = arith.constant 0 : index
    %c0_14 = arith.constant 0 : index
    %7 = vector.load %arg7[%c0_13, %c0_14] : memref<1x1024xf32, #tpu.memory_space<vmem>>, vector<1x1024xf32>
    %c0_15 = arith.constant 0 : index
    %c0_16 = arith.constant 0 : index
    %8 = vector.load %arg8[%c0_15, %c0_16] : memref<1x1024xf32, #tpu.memory_space<vmem>>, vector<1x1024xf32>
    %c0_17 = arith.constant 0 : index
    %c0_18 = arith.constant 0 : index
    %9 = vector.load %arg9[%c0_17, %c0_18] : memref<4x1024xf32, #tpu.memory_space<vmem>>, vector<4x1024xf32>
    %c0_19 = arith.constant 0 : index
    %c0_20 = arith.constant 0 : index
    %10 = vector.load %arg10[%c0_19, %c0_20] : memref<1024x4xf32, #tpu.memory_space<vmem>>, vector<1024x4xf32>
    %c0_21 = arith.constant 0 : index
    %c0_22 = arith.constant 0 : index
    %11 = vector.load %arg11[%c0_21, %c0_22] : memref<1024x256xf32, #tpu.memory_space<vmem>>, vector<1024x256xf32>
    %c1_i32 = arith.constant 1 : i32
    %12 = tpu.dynamic_rotate %3 by %c1_i32 dim 1 : vector<8x1024xf32>, i32 -> vector<8x1024xf32>
    %c993_i32 = arith.constant 993 : i32
    %13 = tpu.dynamic_rotate %3 by %c993_i32 dim 1 : vector<8x1024xf32>, i32 -> vector<8x1024xf32>
    %cst = arith.constant 0.000000e+00 : f32
    %14 = vector.broadcast %cst : f32 to vector<1x1024xf32>
    %15 = arith.cmpf ogt, %8, %14 : vector<1x1024xf32>
    %16 = vector.shape_cast %15 : vector<1x1024xi1> to vector<1x1024xi1>
    %17 = vector.broadcast %16 : vector<1x1024xi1> to vector<8x1024xi1>
    %18 = arith.select %17, %13, %12 : vector<8x1024xi1>, vector<8x1024xf32>
    %c1023_i32 = arith.constant 1023 : i32
    %19 = tpu.dynamic_rotate %3 by %c1023_i32 dim 1 : vector<8x1024xf32>, i32 -> vector<8x1024xf32>
    %c31_i32 = arith.constant 31 : i32
    %20 = tpu.dynamic_rotate %3 by %c31_i32 dim 1 : vector<8x1024xf32>, i32 -> vector<8x1024xf32>
    %cst_23 = arith.constant 0.000000e+00 : f32
    %21 = vector.broadcast %cst_23 : f32 to vector<1x1024xf32>
    %22 = arith.cmpf ogt, %7, %21 : vector<1x1024xf32>
    %23 = vector.shape_cast %22 : vector<1x1024xi1> to vector<1x1024xi1>
    %24 = vector.broadcast %23 : vector<1x1024xi1> to vector<8x1024xi1>
    %25 = arith.select %24, %20, %19 : vector<8x1024xi1>, vector<8x1024xf32>
    %26 = tpu.concatenate %18, %3, %25 in 0 : vector<8x1024xf32>, vector<8x1024xf32>, vector<8x1024xf32> -> vector<24x1024xf32>
    %cst_24 = arith.constant dense<0.000000e+00> : vector<24x1024xf32>
    %27 = tpu.matmul %4, %26, %cst_24 {dimension_numbers = #tpu.dot_dimension_numbers<[1], [0], [0], [1], [0, 0, 1, 1], [], []>} : vector<24x24xf32>, vector<24x1024xf32>, vector<24x1024xf32> -> vector<24x1024xf32>
    %28 = vector.extract_strided_slice %27 {offsets = [0, 0], sizes = [8, 1024], strides = [1, 1]} : vector<24x1024xf32> to vector<8x1024xf32>
    %c32_i32 = arith.constant 32 : i32
    %29 = tpu.dynamic_rotate %28 by %c32_i32 dim 1 : vector<8x1024xf32>, i32 -> vector<8x1024xf32>
    %30 = vector.extract_strided_slice %27 {offsets = [8, 0], sizes = [8, 1024], strides = [1, 1]} : vector<24x1024xf32> to vector<8x1024xf32>
    %31 = arith.addf %29, %30 : vector<8x1024xf32>
    %32 = vector.extract_strided_slice %27 {offsets = [16, 0], sizes = [8, 1024], strides = [1, 1]} : vector<24x1024xf32> to vector<8x1024xf32>
    %c992_i32 = arith.constant 992 : i32
    %33 = tpu.dynamic_rotate %32 by %c992_i32 dim 1 : vector<8x1024xf32>, i32 -> vector<8x1024xf32>
    %34 = arith.addf %31, %33 : vector<8x1024xf32>
    %cst_25 = arith.constant dense<0.000000e+00> : vector<8x1024xf32>
    %35 = tpu.matmul %0, %34, %cst_25 {dimension_numbers = #tpu.dot_dimension_numbers<[1], [0], [0], [1], [0, 0, 1, 1], [], []>} : vector<8x8xf32>, vector<8x1024xf32>, vector<8x1024xf32> -> vector<8x1024xf32>
    %cst_26 = arith.constant dense<0.000000e+00> : vector<8xf32>
    %36 = vector.multi_reduction <add>, %35, %cst_26 [1] : vector<8x1024xf32> to vector<8xf32>
    %37 = vector.shape_cast %36 : vector<8xf32> to vector<8x1xf32>
    %cst_27 = arith.constant 4.8828125E-4 : f32
    %38 = vector.broadcast %cst_27 : f32 to vector<8x1xf32>
    %39 = arith.mulf %37, %38 : vector<8x1xf32>
    %40 = vector.broadcast %39 : vector<8x1xf32> to vector<8x1024xf32>
    %41 = arith.subf %34, %40 : vector<8x1024xf32>
    %42 = arith.mulf %41, %41 : vector<8x1024xf32>
    %cst_28 = arith.constant dense<0.000000e+00> : vector<8x1024xf32>
    %43 = tpu.matmul %0, %42, %cst_28 {dimension_numbers = #tpu.dot_dimension_numbers<[1], [0], [0], [1], [0, 0, 1, 1], [], []>} : vector<8x8xf32>, vector<8x1024xf32>, vector<8x1024xf32> -> vector<8x1024xf32>
    %cst_29 = arith.constant dense<0.000000e+00> : vector<8xf32>
    %44 = vector.multi_reduction <add>, %43, %cst_29 [1] : vector<8x1024xf32> to vector<8xf32>
    %45 = vector.shape_cast %44 : vector<8xf32> to vector<8x1xf32>
    %cst_30 = arith.constant 4.8828125E-4 : f32
    %46 = vector.broadcast %cst_30 : f32 to vector<8x1xf32>
    %47 = arith.mulf %45, %46 : vector<8x1xf32>
    %cst_31 = arith.constant 9.99999974E-6 : f32
    %48 = vector.broadcast %cst_31 : f32 to vector<8x1xf32>
    %49 = arith.addf %47, %48 : vector<8x1xf32>
    %50 = math.rsqrt %49 : vector<8x1xf32>
    %51 = arith.mulf %5, %50 : vector<8x1xf32>
    %52 = vector.broadcast %51 : vector<8x1xf32> to vector<8x1024xf32>
    %53 = arith.mulf %41, %52 : vector<8x1024xf32>
    %54 = vector.broadcast %6 : vector<8x1xf32> to vector<8x1024xf32>
    %55 = arith.addf %53, %54 : vector<8x1024xf32>
    %cst_32 = arith.constant 0.000000e+00 : f32
    %56 = vector.broadcast %cst_32 : f32 to vector<8x1024xf32>
    %57 = arith.cmpf ogt, %55, %56 : vector<8x1024xf32>
    %cst_33 = arith.constant 1.000000e-01 : f32
    %58 = vector.broadcast %cst_33 : f32 to vector<8x1024xf32>
    %59 = arith.mulf %58, %55 : vector<8x1024xf32>
    %60 = arith.select %57, %55, %59 : vector<8x1024xi1>, vector<8x1024xf32>
    %61 = arith.mulf %60, %60 : vector<8x1024xf32>
    %cst_34 = arith.constant dense<0.000000e+00> : vector<8x4xf32>
    %62 = tpu.matmul %61, %10, %cst_34 {dimension_numbers = #tpu.dot_dimension_numbers<[1], [0], [0], [1], [0, 0, 1, 1], [], []>} : vector<8x1024xf32>, vector<1024x4xf32>, vector<8x4xf32> -> vector<8x4xf32>
    %cst_35 = arith.constant dense<0.000000e+00> : vector<8x4xf32>
    %63 = tpu.matmul %1, %62, %cst_35 {dimension_numbers = #tpu.dot_dimension_numbers<[1], [0], [0], [1], [0, 0, 1, 1], [], []>} : vector<8x8xf32>, vector<8x4xf32>, vector<8x4xf32> -> vector<8x4xf32>
    %cst_36 = arith.constant dense<0xFF800000> : vector<8xf32>
    %64 = vector.multi_reduction <maximumf>, %63, %cst_36 [1] : vector<8x4xf32> to vector<8xf32>
    %65 = vector.shape_cast %64 : vector<8xf32> to vector<8x1xf32>
    %66 = vector.broadcast %65 : vector<8x1xf32> to vector<8x4xf32>
    %67 = arith.cmpf oge, %63, %66 : vector<8x4xf32>
    %68 = arith.extui %67 : vector<8x4xi1> to vector<8x4xi32>
    %69 = arith.sitofp %68 : vector<8x4xi32> to vector<8x4xf32>
    %cst_37 = arith.constant dense<0.000000e+00> : vector<8x4xf32>
    %70 = tpu.matmul %69, %2, %cst_37 {dimension_numbers = #tpu.dot_dimension_numbers<[1], [0], [0], [1], [0, 0, 1, 1], [], []>} : vector<8x4xf32>, vector<4x4xf32>, vector<8x4xf32> -> vector<8x4xf32>
    %cst_38 = arith.constant 5.000000e-01 : f32
    %71 = vector.broadcast %cst_38 : f32 to vector<8x4xf32>
    %72 = arith.cmpf olt, %70, %71 : vector<8x4xf32>
    %cst_39 = arith.constant 0.000000e+00 : f32
    %73 = vector.broadcast %cst_39 : f32 to vector<8x4xf32>
    %74 = arith.select %72, %69, %73 : vector<8x4xi1>, vector<8x4xf32>
    %cst_40 = arith.constant dense<0.000000e+00> : vector<8x1024xf32>
    %75 = tpu.matmul %74, %9, %cst_40 {dimension_numbers = #tpu.dot_dimension_numbers<[1], [0], [0], [1], [0, 0, 1, 1], [], []>} : vector<8x4xf32>, vector<4x1024xf32>, vector<8x1024xf32> -> vector<8x1024xf32>
    %76 = arith.mulf %60, %75 : vector<8x1024xf32>
    %cst_41 = arith.constant dense<0.000000e+00> : vector<8x256xf32>
    %77 = tpu.matmul %76, %11, %cst_41 {dimension_numbers = #tpu.dot_dimension_numbers<[1], [0], [0], [1], [0, 0, 1, 1], [], []>} : vector<8x1024xf32>, vector<1024x256xf32>, vector<8x256xf32> -> vector<8x256xf32>
    %c0_42 = arith.constant 0 : index
    %c0_43 = arith.constant 0 : index
    %78 = vector.load %arg12[%c0_42, %c0_43] : memref<24x24xf32, #tpu.memory_space<vmem>>, vector<24x24xf32>
    %c0_44 = arith.constant 0 : index
    %c0_45 = arith.constant 0 : index
    %79 = vector.load %arg13[%c0_44, %c0_45] : memref<8x1xf32, #tpu.memory_space<vmem>>, vector<8x1xf32>
    %c0_46 = arith.constant 0 : index
    %c0_47 = arith.constant 0 : index
    %80 = vector.load %arg14[%c0_46, %c0_47] : memref<8x1xf32, #tpu.memory_space<vmem>>, vector<8x1xf32>
    %c0_48 = arith.constant 0 : index
    %c0_49 = arith.constant 0 : index
    %81 = vector.load %arg15[%c0_48, %c0_49] : memref<1x256xf32, #tpu.memory_space<vmem>>, vector<1x256xf32>
    %c0_50 = arith.constant 0 : index
    %c0_51 = arith.constant 0 : index
    %82 = vector.load %arg16[%c0_50, %c0_51] : memref<1x256xf32, #tpu.memory_space<vmem>>, vector<1x256xf32>
    %c0_52 = arith.constant 0 : index
    %c0_53 = arith.constant 0 : index
    %83 = vector.load %arg17[%c0_52, %c0_53] : memref<4x256xf32, #tpu.memory_space<vmem>>, vector<4x256xf32>
    %c0_54 = arith.constant 0 : index
    %c0_55 = arith.constant 0 : index
    %84 = vector.load %arg18[%c0_54, %c0_55] : memref<256x4xf32, #tpu.memory_space<vmem>>, vector<256x4xf32>
    %c0_56 = arith.constant 0 : index
    %c0_57 = arith.constant 0 : index
    %85 = vector.load %arg19[%c0_56, %c0_57] : memref<256x64xf32, #tpu.memory_space<vmem>>, vector<256x64xf32>
    %c1_i32_58 = arith.constant 1 : i32
    %86 = tpu.dynamic_rotate %77 by %c1_i32_58 dim 1 : vector<8x256xf32>, i32 -> vector<8x256xf32>
    %c241_i32 = arith.constant 241 : i32
    %87 = tpu.dynamic_rotate %77 by %c241_i32 dim 1 : vector<8x256xf32>, i32 -> vector<8x256xf32>
    %cst_59 = arith.constant 0.000000e+00 : f32
    %88 = vector.broadcast %cst_59 : f32 to vector<1x256xf32>
    %89 = arith.cmpf ogt, %82, %88 : vector<1x256xf32>
    %90 = vector.shape_cast %89 : vector<1x256xi1> to vector<1x256xi1>
    %91 = vector.broadcast %90 : vector<1x256xi1> to vector<8x256xi1>
    %92 = arith.select %91, %87, %86 : vector<8x256xi1>, vector<8x256xf32>
    %c255_i32 = arith.constant 255 : i32
    %93 = tpu.dynamic_rotate %77 by %c255_i32 dim 1 : vector<8x256xf32>, i32 -> vector<8x256xf32>
    %c15_i32 = arith.constant 15 : i32
    %94 = tpu.dynamic_rotate %77 by %c15_i32 dim 1 : vector<8x256xf32>, i32 -> vector<8x256xf32>
    %cst_60 = arith.constant 0.000000e+00 : f32
    %95 = vector.broadcast %cst_60 : f32 to vector<1x256xf32>
    %96 = arith.cmpf ogt, %81, %95 : vector<1x256xf32>
    %97 = vector.shape_cast %96 : vector<1x256xi1> to vector<1x256xi1>
    %98 = vector.broadcast %97 : vector<1x256xi1> to vector<8x256xi1>
    %99 = arith.select %98, %94, %93 : vector<8x256xi1>, vector<8x256xf32>
    %100 = tpu.concatenate %92, %77, %99 in 0 : vector<8x256xf32>, vector<8x256xf32>, vector<8x256xf32> -> vector<24x256xf32>
    %cst_61 = arith.constant dense<0.000000e+00> : vector<24x256xf32>
    %101 = tpu.matmul %78, %100, %cst_61 {dimension_numbers = #tpu.dot_dimension_numbers<[1], [0], [0], [1], [0, 0, 1, 1], [], []>} : vector<24x24xf32>, vector<24x256xf32>, vector<24x256xf32> -> vector<24x256xf32>
    %102 = vector.extract_strided_slice %101 {offsets = [0, 0], sizes = [8, 256], strides = [1, 1]} : vector<24x256xf32> to vector<8x256xf32>
    %c16_i32 = arith.constant 16 : i32
    %103 = tpu.dynamic_rotate %102 by %c16_i32 dim 1 : vector<8x256xf32>, i32 -> vector<8x256xf32>
    %104 = vector.extract_strided_slice %101 {offsets = [8, 0], sizes = [8, 256], strides = [1, 1]} : vector<24x256xf32> to vector<8x256xf32>
    %105 = arith.addf %103, %104 : vector<8x256xf32>
    %106 = vector.extract_strided_slice %101 {offsets = [16, 0], sizes = [8, 256], strides = [1, 1]} : vector<24x256xf32> to vector<8x256xf32>
    %c240_i32 = arith.constant 240 : i32
    %107 = tpu.dynamic_rotate %106 by %c240_i32 dim 1 : vector<8x256xf32>, i32 -> vector<8x256xf32>
    %108 = arith.addf %105, %107 : vector<8x256xf32>
    %cst_62 = arith.constant dense<0.000000e+00> : vector<8x256xf32>
    %109 = tpu.matmul %0, %108, %cst_62 {dimension_numbers = #tpu.dot_dimension_numbers<[1], [0], [0], [1], [0, 0, 1, 1], [], []>} : vector<8x8xf32>, vector<8x256xf32>, vector<8x256xf32> -> vector<8x256xf32>
    %cst_63 = arith.constant dense<0.000000e+00> : vector<8xf32>
    %110 = vector.multi_reduction <add>, %109, %cst_63 [1] : vector<8x256xf32> to vector<8xf32>
    %111 = vector.shape_cast %110 : vector<8xf32> to vector<8x1xf32>
    %cst_64 = arith.constant 0.001953125 : f32
    %112 = vector.broadcast %cst_64 : f32 to vector<8x1xf32>
    %113 = arith.mulf %111, %112 : vector<8x1xf32>
    %114 = vector.broadcast %113 : vector<8x1xf32> to vector<8x256xf32>
    %115 = arith.subf %108, %114 : vector<8x256xf32>
    %116 = arith.mulf %115, %115 : vector<8x256xf32>
    %cst_65 = arith.constant dense<0.000000e+00> : vector<8x256xf32>
    %117 = tpu.matmul %0, %116, %cst_65 {dimension_numbers = #tpu.dot_dimension_numbers<[1], [0], [0], [1], [0, 0, 1, 1], [], []>} : vector<8x8xf32>, vector<8x256xf32>, vector<8x256xf32> -> vector<8x256xf32>
    %cst_66 = arith.constant dense<0.000000e+00> : vector<8xf32>
    %118 = vector.multi_reduction <add>, %117, %cst_66 [1] : vector<8x256xf32> to vector<8xf32>
    %119 = vector.shape_cast %118 : vector<8xf32> to vector<8x1xf32>
    %cst_67 = arith.constant 0.001953125 : f32
    %120 = vector.broadcast %cst_67 : f32 to vector<8x1xf32>
    %121 = arith.mulf %119, %120 : vector<8x1xf32>
    %cst_68 = arith.constant 9.99999974E-6 : f32
    %122 = vector.broadcast %cst_68 : f32 to vector<8x1xf32>
    %123 = arith.addf %121, %122 : vector<8x1xf32>
    %124 = math.rsqrt %123 : vector<8x1xf32>
    %125 = arith.mulf %79, %124 : vector<8x1xf32>
    %126 = vector.broadcast %125 : vector<8x1xf32> to vector<8x256xf32>
    %127 = arith.mulf %115, %126 : vector<8x256xf32>
    %128 = vector.broadcast %80 : vector<8x1xf32> to vector<8x256xf32>
    %129 = arith.addf %127, %128 : vector<8x256xf32>
    %cst_69 = arith.constant 0.000000e+00 : f32
    %130 = vector.broadcast %cst_69 : f32 to vector<8x256xf32>
    %131 = arith.cmpf ogt, %129, %130 : vector<8x256xf32>
    %cst_70 = arith.constant 1.000000e-01 : f32
    %132 = vector.broadcast %cst_70 : f32 to vector<8x256xf32>
    %133 = arith.mulf %132, %129 : vector<8x256xf32>
    %134 = arith.select %131, %129, %133 : vector<8x256xi1>, vector<8x256xf32>
    %135 = arith.mulf %134, %134 : vector<8x256xf32>
    %cst_71 = arith.constant dense<0.000000e+00> : vector<8x4xf32>
    %136 = tpu.matmul %135, %84, %cst_71 {dimension_numbers = #tpu.dot_dimension_numbers<[1], [0], [0], [1], [0, 0, 1, 1], [], []>} : vector<8x256xf32>, vector<256x4xf32>, vector<8x4xf32> -> vector<8x4xf32>
    %cst_72 = arith.constant dense<0.000000e+00> : vector<8x4xf32>
    %137 = tpu.matmul %1, %136, %cst_72 {dimension_numbers = #tpu.dot_dimension_numbers<[1], [0], [0], [1], [0, 0, 1, 1], [], []>} : vector<8x8xf32>, vector<8x4xf32>, vector<8x4xf32> -> vector<8x4xf32>
    %cst_73 = arith.constant dense<0xFF800000> : vector<8xf32>
    %138 = vector.multi_reduction <maximumf>, %137, %cst_73 [1] : vector<8x4xf32> to vector<8xf32>
    %139 = vector.shape_cast %138 : vector<8xf32> to vector<8x1xf32>
    %140 = vector.broadcast %139 : vector<8x1xf32> to vector<8x4xf32>
    %141 = arith.cmpf oge, %137, %140 : vector<8x4xf32>
    %142 = arith.extui %141 : vector<8x4xi1> to vector<8x4xi32>
    %143 = arith.sitofp %142 : vector<8x4xi32> to vector<8x4xf32>
    %cst_74 = arith.constant dense<0.000000e+00> : vector<8x4xf32>
    %144 = tpu.matmul %143, %2, %cst_74 {dimension_numbers = #tpu.dot_dimension_numbers<[1], [0], [0], [1], [0, 0, 1, 1], [], []>} : vector<8x4xf32>, vector<4x4xf32>, vector<8x4xf32> -> vector<8x4xf32>
    %cst_75 = arith.constant 5.000000e-01 : f32
    %145 = vector.broadcast %cst_75 : f32 to vector<8x4xf32>
    %146 = arith.cmpf olt, %144, %145 : vector<8x4xf32>
    %cst_76 = arith.constant 0.000000e+00 : f32
    %147 = vector.broadcast %cst_76 : f32 to vector<8x4xf32>
    %148 = arith.select %146, %143, %147 : vector<8x4xi1>, vector<8x4xf32>
    %cst_77 = arith.constant dense<0.000000e+00> : vector<8x256xf32>
    %149 = tpu.matmul %148, %83, %cst_77 {dimension_numbers = #tpu.dot_dimension_numbers<[1], [0], [0], [1], [0, 0, 1, 1], [], []>} : vector<8x4xf32>, vector<4x256xf32>, vector<8x256xf32> -> vector<8x256xf32>
    %150 = arith.mulf %134, %149 : vector<8x256xf32>
    %cst_78 = arith.constant dense<0.000000e+00> : vector<8x64xf32>
    %151 = tpu.matmul %150, %85, %cst_78 {dimension_numbers = #tpu.dot_dimension_numbers<[1], [0], [0], [1], [0, 0, 1, 1], [], []>} : vector<8x256xf32>, vector<256x64xf32>, vector<8x64xf32> -> vector<8x64xf32>
    %c0_79 = arith.constant 0 : index
    %c0_80 = arith.constant 0 : index
    %152 = vector.load %arg20[%c0_79, %c0_80] : memref<8x64xf32, #tpu.memory_space<vmem>>, vector<8x64xf32>
    tpu.vector_store %arg20[%c0_79, %c0_80], %151 {strides = array<i32>} : memref<8x64xf32, #tpu.memory_space<vmem>>, vector<8x64xf32>,
    return
  }
}

</mosaic_0001>

<bundles_post_ra>
// kernel: tpu_custom_call.1
= control target key start
LH: loop header
LB: loop body
LE: loop exit
PB: predicated region body
PF: predicated region fallthrough
CT: control target
= control target key end

     0   :  { %s5356_s0 = inlined_call_operand.vmem [shape: f32[8,1024], index: 0, kind: input, shape index: {}]   ;;  %s5357_s1 = inlined_call_operand.vmem [shape: f32[8,8], index: 1, kind: input, shape index: {}]   ;;  %s5358_s2 = inlined_call_operand.vmem [shape: f32[8,8], index: 2, kind: input, shape index: {}]   ;;  %s5359_s3 = inlined_call_operand.vmem [shape: f32[4,4], index: 3, kind: input, shape index: {}]   ;;  %s5360_s4 = inlined_call_operand.vmem [shape: f32[24,24], index: 4, kind: input, shape index: {}]   ;;  %s5361_s5 = inlined_call_operand.vmem [shape: f32[8,1], index: 5, kind: input, shape index: {}]   ;;  %s5362_s6 = inlined_call_operand.vmem [shape: f32[8,1], index: 6, kind: input, shape index: {}]   ;;  %s5363_s7 = inlined_call_operand.vmem [shape: f32[1,1024], index: 7, kind: input, shape index: {}]   ;;  %s5364_s8 = inlined_call_operand.vmem [shape: f32[1,1024], index: 8, kind: input, shape index: {}]   ;;  %s5365_s9 = inlined_call_operand.vmem [shape: f32[4,1024], index: 9, kind: input, shape index: {}]   ;;  %s5366_s10 = inlined_call_operand.vmem [shape: f32[1024,4], index: 10, kind: input, shape index: {}]   ;;  %s5367_s11 = inlined_call_operand.hbm [shape: f32[1024,256], index: 11, kind: input, shape index: {}]   ;;  %s5368_s12 = inlined_call_operand.vmem [shape: f32[24,24], index: 12, kind: input, shape index: {}]   ;;  %s5369_s13 = inlined_call_operand.vmem [shape: f32[8,1], index: 13, kind: input, shape index: {}]   ;;  %s5370_s14 = inlined_call_operand.vmem [shape: f32[8,1], index: 14, kind: input, shape index: {}]   ;;  %s5371_s15 = inlined_call_operand.vmem [shape: f32[1,256], index: 15, kind: input, shape index: {}]   ;;  %s5372_s16 = inlined_call_operand.vmem [shape: f32[1,256], index: 16, kind: input, shape index: {}]   ;;  %s5373_s17 = inlined_call_operand.vmem [shape: f32[4,256], index: 17, kind: input, shape index: {}]   ;;  %s5374_s18 = inlined_call_operand.vmem [shape: f32[256,4], index: 18, kind: input, shape index: {}]   ;;  %s5375_s19 = inlined_call_operand.vmem [shape: f32[256,64], index: 19, kind: input, shape index: {}]   ;;  %s5376_s20 = inlined_call_operand.hbm [shape: f32[8,64], index: 20, kind: output, shape index: {}]  }
   0x1   :  { %5382 = sst [smem:[#allocation8_spill]] %s5356_s0 }
   0x2   :  { %5383 = sst [smem:[#allocation9_spill]] %s5357_s1 }
   0x3   :  { %5384 = sst [smem:[#allocation10_spill]] %s5358_s2 }
   0x4   :  { %5385 = sst [smem:[#allocation11_spill]] %s5359_s3 }
   0x5   :  { %5386 = sst [smem:[#allocation12_spill]] %s5360_s4 }
   0x6   :  { %25 = vsyncpa [#allocation3], 0 }
   0x7   :  { %26 = vsyncpa [#allocation4], 0  ;;  %s3978_s1 = smov [#allocation2]  }
   0x8   :  { %s54_s22 = sshll.u32 %s3978_s1, 4  ;;  %s55_s22 = int_to_ptr.vmem [resolvable:$true] %s54_s22 }
   0x9   :  { %s3942_s23 = scalar_lea.vmem %s55_s22, 32768  ;;  %p3947_p1 = scmp.lt.s32.totalorder %s55_s22, %s55_s22 }
   0xa   :  { %p3943_p0 = scmp.ne.s32.totalorder %s55_s22, %s3942_s23  ;;  %p3948_p2 = scmp.lt.s32.totalorder %s3942_s23, %s3942_s23 }
   0xc   :  { %p3949_p3 = por %p3948_p2, %p3947_p1 }
   0xe   :  { %p3950_p4 = pnand %p3949_p3, %p3943_p0 }
  0x10   :  { %3953 = shalt.err (!%p3950_p4)
}
  0x11   :  { %s3979_s24 = smov 256   ;;  %s3980_s2 = smov 16  }
  0x12   :  { %60 = dma.hbm_to_vmem [thread:$0]  %s5367_s11, 32768, %s55_s22, [#allocation3], %s3979_s24, %s3979_s24, %s3980_s2  }
  0x13   :  { %3974 = dma.done.wait [#allocation3], 32768  }
  0x14   :  { %3975 = vsyncadd [#allocation3], 4294934528  ;;  %v3981_v0 = vmov 0   ;;  %s5387_s28 = sld [smem:[#allocation8_spill]]  ;;  %s3982_s30 = smov 127   ;;  %v3984_v5 = vmov 0.0   ;;  %v502_v10 = vlaneseq }
  0x15   :  { %3920 = vset.pattern.permute.xlu0 %v3981_v0  ;;  %3921 = vset.pattern.permute.xlu1 %v3981_v0  ;;  %s3983_s11 = smov 31   ;;  %s3985_s23 = smov 1   ;;  %v96_v11 = vld [vmem:[%s5363_s7] sm:$0xff]  ;;  %vm688_vm10 = vcmask 195584  }
  0x16   :  { %762 = vmatprep.mubr.f32.mxu0 %v3984_v5  ;;  %845 = vmatprep.mubr.f32.mxu1 %v3984_v5  ;;  %s3986_s24 = smov 97   ;;  %v4206_v12 = vshrl.u32 %v502_v10, 7  ;;  %vm638_vm0 = vcmp.gt.f32.partialorder %v96_v11, 0.0  ;;  %v4214_v15 = vand.u32 127, %v502_v10  ;;  %v97_v20 = vld [vmem:[%s5364_s8] sm:$0xff]  ;;  %s3987_s4 = smov 32  }
  0x17   :  { %v4212_v14 = vsel %vm638_vm0, 1, %v3981_v0  ;;  %vm538_vm4 = vcmp.gt.f32.partialorder %v97_v20, 0.0  ;;  %s3988_s29 = smov 96   ;;  %s5391_s21 = sld [smem:[#allocation11_spill]] }
  0x18   :  { %v4209_v13 = vsub.s32 1, %v4206_v12  ;;  %v4219_v17 = vsub.s32 0, %v4206_v12  ;;  %vm604_vm1 = vcmp.lt.s32.totalorder %v4214_v15, 127  ;;  %vm629_vm2 = vcmp.lt.s32.totalorder %v4214_v15, 31  ;;  %s3991_s3 = smov 113  }
  0x19   :  { %v4243_v29 = vsel %vm538_vm4, 1, %v3981_v0  ;;  %vm504_vm6 = vcmp.lt.s32.totalorder %v4214_v15, 1  ;;  %vm529_vm7 = vcmp.lt.s32.totalorder %v4214_v15, 97  ;;  %v562_v42 = vsub.s32 5, %v4206_v12 }
  0x1a   :  { %v4108_v1 = vld [vmem:[%s5387_s28 + $0x8] sm:$0xff]  ;;  %v4113_v2 = vld [vmem:[%s5387_s28] sm:$0xff]  ;;  %v4122_v3 = vld [vmem:[%s5387_s28 + $0x10] sm:$0xff]  ;;  %v647_v16 = vrot.slane %v4212_v14, %v4209_v13  ;;  %v643_v21 = vrot.slane %v4212_v14, %v4219_v17  ;;  %v547_v33 = vrot.slane %v4243_v29, %v4209_v13  ;;  %v543_v36 = vrot.slane %v4243_v29, %v4219_v17 }
  0x1b   :  { %590 = vrot.lane.b32.xlu0 %v4108_v1, %s3982_s30  ;;  %613 = vrot.lane.b32.xlu1 %v4113_v2, %s3983_s11  ;;  %v4131_v4 = vld [vmem:[%s5387_s28 + $0x38] sm:$0xff]  ;;  %v4151_v6 = vld [vmem:[%s5387_s28 + $0x28] sm:$0xff]  ;;  %v663_v49 = vrot.slane %v4212_v14, %v562_v42  ;;  %v558_v50 = vsub.s32 4, %v4206_v12  ;;  %v563_v10 = vrot.slane %v4243_v29, %v562_v42 }
  0x1c   :  { %v4156_v7 = vld [vmem:[%s5387_s28 + $0x30] sm:$0xff]  ;;  %v4165_v8 = vld [vmem:[%s5387_s28 + $0x20] sm:$0xff]  ;;  %v4174_v9 = vld [vmem:[%s5387_s28 + $0x18] sm:$0xff]  ;;  %vm673_vm3 = vcmp.eq.s32.totalorder %v647_v16, 1  ;;  %vm672_vm5 = vcmp.eq.s32.totalorder %v643_v21, 1  ;;  %vm573_vm8 = vcmp.eq.s32.totalorder %v547_v33, 1 }
  0x1d   :  { %vm572_vm9 = vcmp.eq.s32.totalorder %v543_v36, 1  ;;  %vm677_vm11 = vcmp.eq.s32.totalorder %v663_v49, 1  ;;  %v659_v54 = vrot.slane %v4212_v14, %v558_v50  ;;  %vm577_vm13 = vcmp.eq.s32.totalorder %v563_v10, 1  ;;  %s5389_s28 = sld [smem:[#allocation9_spill]] }
  0x1e   :  { %v559_v20 = vrot.slane %v4243_v29, %v558_v50 }
  0x1f   :  { %592 = vrot.lane.b32.xlu0 %v4122_v3, %s3982_s30  ;;  %615 = vrot.lane.b32.xlu1 %v4108_v1, %s3983_s11  ;;  %vm676_vm12 = vcmp.eq.s32.totalorder %v659_v54, 1 }
  0x20   :  { %vm576_vm14 = vcmp.eq.s32.totalorder %v559_v20, 1 }
  0x23   :  { %588 = vrot.lane.b32.xlu0 %v4113_v2, %s3982_s30  ;;  %627 = vrot.lane.b32.xlu1 %v4131_v4, %s3983_s11 }
  0x27   :  { %486 = vrot.lane.b32.xlu0 %v4113_v2, %s3985_s23  ;;  %488 = vrot.lane.b32.xlu1 %v4108_v1, %s3985_s23 }
  0x2b   :  { %515 = vrot.lane.b32.xlu0 %v4108_v1, %s3986_s24  ;;  %517 = vrot.lane.b32.xlu1 %v4122_v3, %s3986_s24 }
  0x2f   :  { %500 = vrot.lane.b32.xlu0 %v4131_v4, %s3985_s23  ;;  %513 = vrot.lane.b32.xlu1 %v4113_v2, %s3986_s24 }
  0x33   :  { %598 = vrot.lane.b32.xlu0 %v4151_v6, %s3982_s30  ;;  %600 = vrot.lane.b32.xlu1 %v4156_v7, %s3982_s30 }
  0x37   :  { %621 = vrot.lane.b32.xlu0 %v4165_v8, %s3983_s11  ;;  %623 = vrot.lane.b32.xlu1 %v4151_v6, %s3983_s11 }
  0x3b   :  { %596 = vrot.lane.b32.xlu0 %v4165_v8, %s3982_s30  ;;  %619 = vrot.lane.b32.xlu1 %v4174_v9, %s3983_s11 }
  0x3f   :  { %494 = vrot.lane.b32.xlu0 %v4165_v8, %s3985_s23  ;;  %496 = vrot.lane.b32.xlu1 %v4151_v6, %s3985_s23 }
  0x43   :  { %523 = vrot.lane.b32.xlu0 %v4151_v6, %s3986_s24  ;;  %525 = vrot.lane.b32.xlu1 %v4156_v7, %s3986_s24 }
  0x47   :  { %492 = vrot.lane.b32.xlu0 %v4174_v9, %s3985_s23  ;;  %521 = vrot.lane.b32.xlu1 %v4165_v8, %s3986_s24 }
  0x4b   :  { %594 = vrot.lane.b32.xlu0 %v4174_v9, %s3982_s30  ;;  %617 = vrot.lane.b32.xlu1 %v4122_v3, %s3983_s11 }
  0x4f   :  { %490 = vrot.lane.b32.xlu0 %v4122_v3, %s3985_s23  ;;  %519 = vrot.lane.b32.xlu1 %v4174_v9, %s3986_s24 }
  0x53   :  { %602 = vrot.lane.b32.xlu0 %v4131_v4, %s3982_s30  ;;  %625 = vrot.lane.b32.xlu1 %v4156_v7, %s3983_s11  ;;  %s3993_s11 = smov [#allocation5]  }
  0x54   :  { %s3603_s8 = sshll.u32 %s3993_s11, 4  ;;  %s3604_s8 = int_to_ptr.vmem [resolvable:$true] %s3603_s8 }
  0x55   :  { %p3959_p6 = scmp.lt.s32.totalorder %s3604_s8, %s3604_s8 }
  0x57   :  { %498 = vrot.lane.b32.xlu0 %v4156_v7, %s3985_s23  ;;  %527 = vrot.lane.b32.xlu1 %v4131_v4, %s3986_s24  ;;  %s5388_s24 = sld [smem:[#allocation12_spill]] }
  0x5d   :  { %v4283_v47 = vld [vmem:[%s5388_s24] sm:$0xff]  ;;  %v4295_v53 = vld [vmem:[%s5388_s24 + $0x8] sm:$0xff]  ;;  %v4312_v59 = vld [vmem:[%s5388_s24 + $0x10] sm:$0xff] }
  0x8d   :  { %v591_v18 = vpop.permute.xlu0 %590  ;;  %v614_v19 = vpop.permute.xlu1 %613 }
  0x91   :  { %v4228_v22 = vpop.permute.xlu0 %592  ;;  %v4230_v23 = vpop.permute.xlu1 %615 }
  0x92   :  { %v610_v24 = vsel %vm604_vm1, %v591_v18, %v4228_v22  ;;  %v636_v25 = vsel %vm629_vm2, %v614_v19, %v4230_v23 }
  0x93   :  { %v681_v26 = vsel %vm673_vm3, %v636_v25, %v610_v24 }
  0x94   :  { %724 = vmatprep.subr.mxu0 %v681_v26 }
  0x95   :  { %v4238_v27 = vpop.permute.xlu0 %588  ;;  %v4240_v28 = vpop.permute.xlu1 %627 }
  0x96   :  { %v611_v30 = vsel %vm604_vm1, %v4238_v27, %v591_v18  ;;  %v637_v31 = vsel %vm629_vm2, %v4240_v28, %v614_v19  ;;  %v554_v18 = vsub.s32 3, %v4206_v12  ;;  %v550_v19 = vsub.s32 2, %v4206_v12 }
  0x97   :  { %v680_v32 = vsel %vm672_vm5, %v637_v31, %v611_v30 }
  0x98   :  { %725 = vmatpush1.msra.mxu0 %v680_v32  ;;  %v651_v30 = vrot.slane %v4212_v14, %v550_v19 }
  0x99   :  { %v487_v34 = vpop.permute.xlu0 %486  ;;  %v4253_v35 = vpop.permute.xlu1 %488  ;;  %726 = vmatprep.subr.mxu0 %v4108_v1 }
  0x9a   :  { %727 = vmatpush1.msra.mxu0 %v4113_v2  ;;  %v511_v39 = vsel %vm504_vm6, %v487_v34, %v4253_v35  ;;  %vm674_vm0 = vcmp.eq.s32.totalorder %v651_v30, 1 }
  0x9d   :  { %v516_v37 = vpop.permute.xlu0 %515  ;;  %v4261_v38 = vpop.permute.xlu1 %517 }
  0x9e   :  { %v535_v40 = vsel %vm529_vm7, %v516_v37, %v4261_v38 }
  0x9f   :  { %v581_v41 = vsel %vm573_vm8, %v535_v40, %v511_v39  ;;  %v551_v39 = vrot.slane %v4243_v29, %v550_v19  ;;  %v570_v40 = vsub.s32 7, %v4206_v12 }
  0xa0   :  { %728 = vmatprep.subr.mxu0 %v581_v41  ;;  %v566_v41 = vsub.s32 6, %v4206_v12 }
  0xa1   :  { %v4270_v43 = vpop.permute.xlu0 %500  ;;  %v4272_v44 = vpop.permute.xlu1 %513  ;;  %vm574_vm4 = vcmp.eq.s32.totalorder %v551_v39, 1  ;;  %v671_v54 = vrot.slane %v4212_v14, %v570_v40 }
  0xa2   :  { %v512_v45 = vsel %vm504_vm6, %v4270_v43, %v487_v34  ;;  %v536_v46 = vsel %vm529_vm7, %v4272_v44, %v516_v37  ;;  %v555_v37 = vrot.slane %v4243_v29, %v554_v18 }
  0xa3   :  { %v580_v48 = vsel %vm572_vm9, %v536_v46, %v512_v45  ;;  %vm679_vm5 = vcmp.eq.s32.totalorder %v671_v54, 1 }
  0xa4   :  { %729 = vmatpush1.msra.mxu0 %v580_v48  ;;  %vm575_vm3 = vcmp.eq.s32.totalorder %v555_v37, 1 }
  0xa5   :  { %v599_v51 = vpop.permute.xlu0 %598  ;;  %3612 = vmatmul.mubr.msk.f32.vlgmr.msra.gmra.mxu0 %vm688_vm10, %v4283_v47  ;;  %v4289_v52 = vpop.permute.xlu1 %600 }
  0xa6   :  { %768 = vmatprep.mubr.f32.mxu0 %v3984_v5  ;;  %v606_v57 = vsel %vm604_vm1, %v599_v51, %v4289_v52 }
  0xa9   :  { %v622_v55 = vpop.permute.xlu0 %621  ;;  %v4298_v56 = vpop.permute.xlu1 %623  ;;  %3613 = vmatmul.mubr.msk.f32.gmra.mxu0 %vm688_vm10, %v4295_v53 }
  0xaa   :  { %v632_v58 = vsel %vm629_vm2, %v622_v55, %v4298_v56  ;;  %774 = vmatprep.mubr.f32.mxu0 %v3984_v5 }
  0xab   :  { %v685_v60 = vsel %vm677_vm11, %v632_v58, %v606_v57 }
  0xac   :  { %890 = vmatprep.subr.mxu0 %v685_v60 }
  0xad   :  { %v597_v61 = vpop.permute.xlu0 %596  ;;  %v620_v62 = vpop.permute.xlu1 %619  ;;  %3614 = vmatmul.mubr.msk.f32.gmra.mxu0 %vm688_vm10, %v4312_v59 }
  0xae   :  { %v607_v63 = vsel %vm604_vm1, %v597_v61, %v599_v51  ;;  %v633_v1 = vsel %vm629_vm2, %v620_v62, %v622_v55  ;;  %928 = vmatprep.mubr.f32.mxu0 %v3984_v5  ;;  %v667_v55 = vrot.slane %v4212_v14, %v566_v41 }
  0xaf   :  { %v684_v2 = vsel %vm676_vm12, %v633_v1, %v607_v63  ;;  %v567_v63 = vrot.slane %v4243_v29, %v566_v41  ;;  %vm1096_vm12 = vcmask 64512  }
  0xb0   :  { %891 = vmatpush1.msra.mxu0 %v684_v2  ;;  %vm678_vm8 = vcmp.eq.s32.totalorder %v667_v55, 1 }
  0xb1   :  { %v495_v11 = vpop.permute.xlu0 %494  ;;  %v4322_v16 = vpop.permute.xlu1 %496  ;;  %892 = vmatprep.subr.mxu0 %v4151_v6  ;;  %vm578_vm11 = vcmp.eq.s32.totalorder %v567_v63, 1 }
  0xb2   :  { %893 = vmatpush1.msra.mxu0 %v4165_v8  ;;  %v507_v25 = vsel %vm504_vm6, %v495_v11, %v4322_v16  ;;  %v655_v8 = vrot.slane %v4212_v14, %v554_v18 }
  0xb4   :  { %vm675_vm15 = vcmp.eq.s32.totalorder %v655_v8, 1 }
  0xb5   :  { %v524_v21 = vpop.permute.xlu0 %523  ;;  %v4329_v24 = vpop.permute.xlu1 %525 }
  0xb6   :  { %v531_v6 = vsel %vm529_vm7, %v524_v21, %v4329_v24 }
  0xb7   :  { %v585_v26 = vsel %vm577_vm13, %v531_v6, %v507_v25 }
  0xb8   :  { %894 = vmatprep.subr.mxu0 %v585_v26 }
  0xb9   :  { %v493_v31 = vpop.permute.xlu0 %492  ;;  %v522_v32 = vpop.permute.xlu1 %521 }
  0xba   :  { %v508_v33 = vsel %vm504_vm6, %v493_v31, %v495_v11  ;;  %v532_v34 = vsel %vm529_vm7, %v522_v32, %v524_v21 }
  0xbb   :  { %v584_v36 = vsel %vm576_vm14, %v532_v34, %v508_v33 }
  0xbc   :  { %895 = vmatpush1.msra.mxu0 %v584_v36 }
  0xbd   :  { %v595_v42 = vpop.permute.xlu0 %594  ;;  %v618_v45 = vpop.permute.xlu1 %617  ;;  %3618 = vmatmul.mubr.msk.f32.vlgmr.msra.gmra.mxu0 %vm688_vm10, %v4283_v47 }
  0xbe   :  { %v608_v46 = vsel %vm604_vm1, %v595_v42, %v597_v61  ;;  %v609_v48 = vsel %vm604_vm1, %v4228_v22, %v595_v42  ;;  %v634_v49 = vsel %vm629_vm2, %v618_v45, %v620_v62  ;;  %v635_v50 = vsel %vm629_vm2, %v4230_v23, %v618_v45  ;;  %934 = vmatprep.mubr.f32.mxu0 %v3984_v5 }
  0xbf   :  { %v683_v12 = vsel %vm675_vm15, %v634_v49, %v608_v46  ;;  %v682_v51 = vsel %vm674_vm0, %v635_v50, %v609_v48 }
  0xc0   :  { %807 = vmatprep.subr.mxu1 %v683_v12 }
  0xc1   :  { %v491_v57 = vpop.permute.xlu0 %490  ;;  %808 = vmatpush1.msra.mxu1 %v682_v51  ;;  %v520_v22 = vpop.permute.xlu1 %519  ;;  %3619 = vmatmul.mubr.msk.f32.gmra.mxu0 %vm688_vm10, %v4295_v53 }
  0xc2   :  { %v509_v23 = vsel %vm504_vm6, %v491_v57, %v493_v31  ;;  %v510_v58 = vsel %vm504_vm6, %v4253_v35, %v491_v57  ;;  %v533_v60 = vsel %vm529_vm7, %v520_v22, %v522_v32  ;;  %v534_v14 = vsel %vm529_vm7, %v4261_v38, %v520_v22  ;;  %809 = vmatprep.subr.mxu1 %v4174_v9 }
  0xc3   :  { %810 = vmatpush1.msra.mxu1 %v4122_v3  ;;  %v583_v61 = vsel %vm575_vm3, %v533_v60, %v509_v23  ;;  %v582_v62 = vsel %vm574_vm4, %v534_v14, %v510_v58  ;;  %940 = vmatprep.mubr.f32.mxu0 %v3984_v5  ;;  %v571_v35 = vrot.slane %v4243_v29, %v570_v40 }
  0xc4   :  { %811 = vmatprep.subr.mxu1 %v583_v61 }
  0xc5   :  { %v603_v1 = vpop.permute.xlu0 %602  ;;  %812 = vmatpush1.msra.mxu1 %v582_v62  ;;  %v626_v2 = vpop.permute.xlu1 %625  ;;  %3620 = vmatmul.mubr.msk.f32.gmra.mxu0 %vm688_vm10, %v4312_v59  ;;  %vm579_vm9 = vcmp.eq.s32.totalorder %v571_v35, 1 }
  0xc6   :  { %v605_v3 = vsel %vm604_vm1, %v4289_v52, %v603_v1  ;;  %v612_v9 = vsel %vm604_vm1, %v603_v1, %v4238_v27  ;;  %v630_v38 = vsel %vm629_vm2, %v626_v2, %v4240_v28  ;;  %v631_v29 = vsel %vm629_vm2, %v4298_v56, %v626_v2  ;;  %3615 = vmatmul.mubr.msk.f32.vlgmr.msra.gmra.mxu1 %vm688_vm10, %v4283_v47 }
  0xc7   :  { %v687_v10 = vsel %vm679_vm5, %v630_v38, %v612_v9  ;;  %851 = vmatprep.mubr.f32.mxu1 %v3984_v5  ;;  %v686_v11 = vsel %vm678_vm8, %v631_v29, %v605_v3  ;;  %1011 = vmatprep.mubr.f32.mxu0 %v3984_v5  ;;  %vm1046_vm2 = vcmp.lt.s32.totalorder %v4214_v15, 32  ;;  %v4470_v9 = vld [vmem:[%s5389_s28] sm:$0xff] }
  0xc8   :  { %973 = vmatprep.subr.mxu0 %v687_v10  ;;  %3898 = vmatprep.subr.mxu1 %v687_v10 }
  0xc9   :  { %v499_v27 = vpop.permute.xlu0 %498  ;;  %974 = vmatpush1.msra.mxu0 %v686_v11  ;;  %3901 = vmatpush1.msra.mxu1 %v686_v11  ;;  %v528_v28 = vpop.permute.xlu1 %527 }
  0xca   :  { %v505_v52 = vsel %vm504_vm6, %v499_v27, %v4270_v43  ;;  %v506_v56 = vsel %vm504_vm6, %v4322_v16, %v499_v27  ;;  %v530_v18 = vsel %vm529_vm7, %v4329_v24, %v528_v28  ;;  %v537_v19 = vsel %vm529_vm7, %v528_v28, %v4272_v44  ;;  %3616 = vmatmul.mubr.msk.f32.gmra.mxu1 %vm688_vm10, %v4295_v53 }
  0xcb   :  { %975 = vmatprep.subr.mxu0 %v4131_v4  ;;  %3899 = vmatprep.subr.mxu1 %v4131_v4  ;;  %v587_v43 = vsel %vm579_vm9, %v537_v19, %v505_v52  ;;  %v586_v20 = vsel %vm578_vm11, %v530_v18, %v506_v56  ;;  %vm1079_vm7 = vcmp.lt.s32.totalorder %v4214_v15, 96  ;;  %vm3989_vm9 = vmmov 0  }
  0xcc   :  { %976 = vmatpush1.msra.mxu0 %v4156_v7  ;;  %3902 = vmatpush1.msra.mxu1 %v4156_v7  ;;  %vm2118_vm11 = vcmask 31744  }
  0xcd   :  { %977 = vmatprep.subr.mxu0 %v587_v43  ;;  %3900 = vmatprep.subr.mxu1 %v587_v43 }
  0xce   :  { %857 = vmatprep.mubr.f32.mxu1 %v3984_v5  ;;  %978 = vmatpush1.msra.mxu0 %v586_v20 }
  0xcf   :  { %3903 = vmatpush1.msra.mxu1 %v586_v20  ;;  %3621 = vmatmul.mubr.msk.f32.vlgmr.msra.gmra.mxu0 %vm688_vm10, %v4283_v47 }
  0xd0   :  { %3617 = vmatmul.mubr.msk.f32.gmra.mxu1 %vm688_vm10, %v4312_v59  ;;  %1017 = vmatprep.mubr.f32.mxu0 %v3984_v5 }
  0xd1   :  { %1023 = vmatprep.mubr.f32.mxu1 %v3984_v5 }
  0xd3   :  { %3622 = vmatmul.mubr.msk.f32.gmra.mxu0 %vm688_vm10, %v4295_v53 }
  0xd4   :  { %3623 = vmatmul.mubr.msk.f32.vlgmr.msra.gmra.mxu1 %vm688_vm10, %v4312_v59  ;;  %1164 = vmatprep.mubr.f32.mxu0 %v3984_v5 }
  0xd5   :  { %1235 = vmatprep.mubr.f32.mxu1 %v3984_v5 }
 0x165   :  { %v764_v4 = vpop.f32.mrf.mxu0 }
 0x166   :  { %1030 = vrot.lane.b32.xlu0 %v764_v4, %s3987_s4 }
 0x167   :  { %v766_v7 = vpop.f32.mrf.mxu0 }
 0x168   :  { %1032 = vrot.lane.b32.xlu1 %v766_v7, %s3987_s4 }
 0x169   :  { %v4430_v44 = vpop.f32.mrf.mxu0 }
 0x16b   :  { %v772_v47 = vpop.f32.mrf.mxu0 }
 0x16d   :  { %v776_v16 = vpop.f32.mrf.mxu0 }
 0x16f   :  { %v778_v21 = vpop.f32.mrf.mxu0 }
 0x17d   :  { %v930_v53 = vpop.f32.mrf.mxu0 }
 0x17f   :  { %v932_v24 = vpop.f32.mrf.mxu0 }
 0x181   :  { %v4432_v25 = vpop.f32.mrf.mxu0 }
 0x183   :  { %v4435_v26 = vpop.f32.mrf.mxu0 }
 0x185   :  { %v942_v31 = vpop.f32.mrf.mxu0 }
 0x186   :  { %v847_v59 = vpop.f32.mrf.mxu1 }
 0x187   :  { %1034 = vrot.lane.b32.xlu0 %v847_v59, %s3987_s4  ;;  %v944_v33 = vpop.f32.mrf.mxu0 }
 0x188   :  { %v849_v6 = vpop.f32.mrf.mxu1 }
 0x189   :  { %1036 = vrot.lane.b32.xlu1 %v849_v6, %s3987_s4 }
 0x18a   :  { %v853_v8 = vpop.f32.mrf.mxu1 }
 0x18c   :  { %v855_v30 = vpop.f32.mrf.mxu1 }
 0x18d   :  { %1063 = vrot.lane.b32.xlu1 %v776_v16, %s3988_s29 }
 0x18f   :  { %v1013_v36 = vpop.f32.mrf.mxu0 }
 0x190   :  { %v859_v32 = vpop.f32.mrf.mxu1 }
 0x191   :  { %1067 = vrot.lane.b32.xlu0 %v859_v32, %s3988_s29  ;;  %1065 = vrot.lane.b32.xlu1 %v778_v21, %s3988_s29  ;;  %v1015_v37 = vpop.f32.mrf.mxu0 }
 0x192   :  { %v861_v34 = vpop.f32.mrf.mxu1 }
 0x193   :  { %v1019_v4 = vpop.f32.mrf.mxu0 }
 0x194   :  { %v1025_v39 = vpop.f32.mrf.mxu1 }
 0x195   :  { %1069 = vrot.lane.b32.xlu0 %v861_v34, %s3988_s29  ;;  %1071 = vrot.lane.b32.xlu1 %v942_v31, %s3988_s29 }
 0x196   :  { %v1027_v40 = vpop.f32.mrf.mxu1 }
 0x199   :  { %1044 = vrot.lane.b32.xlu0 %v1015_v37, %s3987_s4  ;;  %1040 = vrot.lane.b32.xlu1 %v932_v24, %s3987_s4 }
 0x19d   :  { %1038 = vrot.lane.b32.xlu0 %v930_v53, %s3987_s4  ;;  %1075 = vrot.lane.b32.xlu1 %v1025_v39, %s3988_s29  ;;  %v1021_v53 = vpop.f32.mrf.mxu0 }
 0x1a1   :  { %1073 = vrot.lane.b32.xlu0 %v944_v33, %s3988_s29  ;;  %1077 = vrot.lane.b32.xlu1 %v1027_v40, %s3988_s29 }
 0x1a5   :  { %1042 = vrot.lane.b32.xlu0 %v1013_v36, %s3987_s4 }
 0x1d8   :  { %v1031_v42 = vpop.permute.xlu0 %1030 }
 0x1da   :  { %v1033_v41 = vpop.permute.xlu1 %1032 }
 0x1db   :  { %v1053_v49 = vsel %vm1046_vm2, %v1031_v42, %v1033_v41 }
 0x1dc   :  { %v1056_v50 = vadd.f32 %v1053_v49, %v772_v47 }
 0x1f9   :  { %v1035_v46 = vpop.permute.xlu0 %1034 }
 0x1fa   :  { %v1052_v57 = vsel %vm1046_vm2, %v1033_v41, %v1035_v46 }
 0x1fb   :  { %v1037_v45 = vpop.permute.xlu1 %1036  ;;  %v1057_v14 = vadd.f32 %v1052_v57, %v853_v8 }
 0x1fc   :  { %v1051_v54 = vsel %vm1046_vm2, %v1035_v46, %v1037_v45 }
 0x1fd   :  { %v1058_v23 = vadd.f32 %v1051_v54, %v855_v30 }
 0x1ff   :  { %v1064_v48 = vpop.permute.xlu1 %1063 }
 0x203   :  { %v1068_v12 = vpop.permute.xlu0 %1067  ;;  %v1066_v51 = vpop.permute.xlu1 %1065 }
 0x204   :  { %v1085_v55 = vsel %vm1079_vm7, %v1066_v51, %v1068_v12  ;;  %v1086_v29 = vsel %vm1079_vm7, %v1064_v48, %v1066_v51 }
 0x205   :  { %v4452_v22 = vadd.f32 %v1085_v55, %v1056_v50 }
 0x207   :  { %v1070_v58 = vpop.permute.xlu0 %1069  ;;  %1130 = vmatprep.subr.mxu0 %v4452_v22  ;;  %v1072_v60 = vpop.permute.xlu1 %1071 }
 0x208   :  { %v1084_v61 = vsel %vm1079_vm7, %v1068_v12, %v1070_v58  ;;  %v1083_v62 = vsel %vm1079_vm7, %v1070_v58, %v1072_v60 }
 0x209   :  { %v4459_v35 = vadd.f32 %v1083_v62, %v1058_v23  ;;  %v4461_v63 = vadd.f32 %v1084_v61, %v1057_v14 }
 0x20b   :  { %v1045_v1 = vpop.permute.xlu0 %1044  ;;  %1201 = vmatprep.subr.mxu1 %v4459_v35  ;;  %v1041_v2 = vpop.permute.xlu1 %1040 }
 0x20c   :  { %v1054_v3 = vsel %vm1046_vm2, %v1045_v1, %v1031_v42  ;;  %1202 = vmatpush1.msra.mxu1 %v4461_v63 }
 0x20d   :  { %v1055_v38 = vadd.f32 %v1054_v3, %v4430_v44  ;;  %3625 = vmatmul.mubr.msk.f32.vlgmr.msra.gmra.mxu1 %vm1096_vm12, %v4470_v9 }
 0x20e   :  { %1377 = vmatprep.mubr.f32.mxu1 %v3984_v5 }
 0x20f   :  { %v1088_v10 = vadd.f32 %v1086_v29, %v1055_v38  ;;  %v1039_v11 = vpop.permute.xlu0 %1038  ;;  %v1076_v52 = vpop.permute.xlu1 %1075 }
 0x210   :  { %v1049_v27 = vsel %vm1046_vm2, %v1039_v11, %v1041_v2  ;;  %v1050_v28 = vsel %vm1046_vm2, %v1037_v45, %v1039_v11 }
 0x211   :  { %1131 = vmatpush1.msra.mxu0 %v1088_v10  ;;  %v1059_v56 = vadd.f32 %v1050_v28, %v4432_v25  ;;  %v1060_v18 = vadd.f32 %v1049_v27, %v4435_v26 }
 0x212   :  { %3624 = vmatmul.mubr.msk.f32.vlgmr.msra.gmra.mxu0 %vm1096_vm12, %v4470_v9 }
 0x213   :  { %v1074_v19 = vpop.permute.xlu0 %1073  ;;  %1306 = vmatprep.mubr.f32.mxu0 %v3984_v5  ;;  %v1078_v47 = vpop.permute.xlu1 %1077 }
 0x214   :  { %v1081_v43 = vsel %vm1079_vm7, %v1074_v19, %v1076_v52  ;;  %v1082_v20 = vsel %vm1079_vm7, %v1072_v60, %v1074_v19  ;;  %v1080_v6 = vsel %vm1079_vm7, %v1076_v52, %v1078_v47  ;;  %v1087_v26 = vsel %vm1079_vm7, %v1078_v47, %v1064_v48 }
 0x215   :  { %v1092_v7 = vadd.f32 %v1082_v20, %v1059_v56  ;;  %v1093_v44 = vadd.f32 %v1081_v43, %v1060_v18 }
 0x217   :  { %v1043_v16 = vpop.permute.xlu0 %1042  ;;  %1272 = vmatprep.subr.mxu0 %v1093_v44 }
 0x218   :  { %v1048_v21 = vsel %vm1046_vm2, %v1041_v2, %v1043_v16  ;;  %v1047_v24 = vsel %vm1046_vm2, %v1043_v16, %v1045_v1  ;;  %1273 = vmatpush1.msra.mxu0 %v1092_v7  ;;  %v133_v16 = vld [vmem:[%s5366_s10 + $0xf8] sm:$0xff]  ;;  %vm2128_vm2 = vcmask 1043456  }
 0x219   :  { %v1061_v25 = vadd.f32 %v1048_v21, %v1019_v4  ;;  %v1062_v59 = vadd.f32 %v1047_v24, %v1021_v53  ;;  %3626 = vmatmul.mubr.msk.f32.vlgmr.msra.gmra.mxu0 %vm1096_vm12, %v4470_v9  ;;  %v165_v21 = vld [vmem:[%s5366_s10 + $0x1f8] sm:$0xff] }
 0x21a   :  { %1474 = vmatprep.mubr.f32.mxu0 %v3984_v5  ;;  %v117_v53 = vld [vmem:[%s5366_s10 + $0x78] sm:$0xff] }
 0x21b   :  { %v1094_v8 = vadd.f32 %v1080_v6, %v1061_v25  ;;  %v1095_v30 = vadd.f32 %v1087_v26, %v1062_v59  ;;  %v149_v24 = vld [vmem:[%s5366_s10 + $0x178] sm:$0xff]  ;;  %v132_v25 = vld [vmem:[%s5366_s10 + $0xf0] sm:$0xff] }
 0x21c   :  { %v164_v59 = vld [vmem:[%s5366_s10 + $0x1f0] sm:$0xff] }
 0x21d   :  { %1343 = vmatprep.subr.mxu1 %v1095_v30  ;;  %v116_v6 = vld [vmem:[%s5366_s10 + $0x70] sm:$0xff] }
 0x21e   :  { %1344 = vmatpush1.msra.mxu1 %v1094_v8  ;;  %v148_v26 = vld [vmem:[%s5366_s10 + $0x170] sm:$0xff] }
 0x21f   :  { %3627 = vmatmul.mubr.msk.f32.vlgmr.msra.gmra.mxu1 %vm1096_vm12, %v4470_v9 }
 0x220   :  { %1545 = vmatprep.mubr.f32.mxu1 %v3984_v5 }
 0x2cd   :  { %v1237_v32 = vpop.f32.mrf.mxu1 }
 0x2cf   :  { %v1239_v36 = vpop.f32.mrf.mxu1 }
 0x2d2   :  { %v1166_v31 = vpop.f32.mrf.mxu0 }
 0x2d4   :  { %v1168_v33 = vpop.f32.mrf.mxu0 }
 0x2d5   :  { %v1384_v34 = vadd.f32 %v1168_v33, %v1166_v31  ;;  %v115_v31 = vld [vmem:[%s5366_s10 + $0x68] sm:$0xff]  ;;  %v130_v33 = vld [vmem:[%s5366_s10 + $0xe0] sm:$0xff] }
 0x2d7   :  { %v1385_v37 = vadd.f32 %v1384_v34, %v1237_v32  ;;  %v147_v32 = vld [vmem:[%s5366_s10 + $0x168] sm:$0xff]  ;;  %v162_v34 = vld [vmem:[%s5366_s10 + $0x1e0] sm:$0xff] }
 0x2d9   :  { %v1386_v39 = vadd.f32 %v1385_v37, %v1239_v36  ;;  %v1308_v40 = vpop.f32.mrf.mxu0  ;;  %v114_v36 = vld [vmem:[%s5366_s10 + $0x60] sm:$0xff] }
 0x2da   :  { %v146_v37 = vld [vmem:[%s5366_s10 + $0x160] sm:$0xff] }
 0x2db   :  { %v1387_v41 = vadd.f32 %v1386_v39, %v1308_v40  ;;  %v1310_v42 = vpop.f32.mrf.mxu0  ;;  %v129_v39 = vld [vmem:[%s5366_s10 + $0xd8] sm:$0xff] }
 0x2dc   :  { %v161_v40 = vld [vmem:[%s5366_s10 + $0x1d8] sm:$0xff] }
 0x2dd   :  { %v1388_v45 = vadd.f32 %v1387_v41, %v1310_v42  ;;  %v113_v41 = vld [vmem:[%s5366_s10 + $0x58] sm:$0xff] }
 0x2de   :  { %v145_v42 = vld [vmem:[%s5366_s10 + $0x158] sm:$0xff] }
 0x2df   :  { %v1379_v46 = vpop.f32.mrf.mxu1 }
 0x2e0   :  { %v1389_v48 = vadd.f32 %v1388_v45, %v1379_v46  ;;  %v128_v45 = vld [vmem:[%s5366_s10 + $0xd0] sm:$0xff] }
 0x2e1   :  { %v1381_v49 = vpop.f32.mrf.mxu1  ;;  %v160_v46 = vld [vmem:[%s5366_s10 + $0x1d0] sm:$0xff] }
 0x2e2   :  { %v1390_v50 = vadd.f32 %v1389_v48, %v1381_v49  ;;  %v112_v48 = vld [vmem:[%s5366_s10 + $0x50] sm:$0xff] }
 0x2e3   :  { %v144_v49 = vld [vmem:[%s5366_s10 + $0x150] sm:$0xff] }
 0x2e4   :  { %1391 = vadd.xlane.f32.xlu0 %v1390_v50  ;;  %v127_v50 = vld [vmem:[%s5366_s10 + $0xc8] sm:$0xff] }
 0x36d   :  { %v1392_v12 = vpop.xlane.xlu0 %1391 }
 0x36e   :  { %v1393_v51 = vmul.f32 0.00048828125, %v1392_v12  ;;  %v159_v12 = vld [vmem:[%s5366_s10 + $0x1c8] sm:$0xff] }
 0x370   :  { %v4506_v54 = vsub.f32 %v4452_v22, %v1393_v51  ;;  %v4509_v55 = vsub.f32 %v4459_v35, %v1393_v51  ;;  %v4511_v57 = vsub.f32 %v1088_v10, %v1393_v51  ;;  %v4514_v23 = vsub.f32 %v4461_v63, %v1393_v51 }
 0x371   :  { %v4516_v58 = vsub.f32 %v1093_v44, %v1393_v51  ;;  %v4518_v60 = vsub.f32 %v1095_v30, %v1393_v51  ;;  %v4520_v14 = vsub.f32 %v1092_v7, %v1393_v51  ;;  %v4522_v61 = vsub.f32 %v1094_v8, %v1393_v51  ;;  %v131_v8 = vld [vmem:[%s5366_s10 + $0xe8] sm:$0xff] }
 0x372   :  { %v1403_v22 = vmul.f32 %v4506_v54, %v4506_v54  ;;  %v1405_v62 = vmul.f32 %v4509_v55, %v4509_v55  ;;  %v1402_v35 = vmul.f32 %v4511_v57, %v4511_v57  ;;  %v1404_v63 = vmul.f32 %v4514_v23, %v4514_v23  ;;  %v163_v30 = vld [vmem:[%s5366_s10 + $0x1e8] sm:$0xff] }
 0x373   :  { %v1407_v1 = vmul.f32 %v4516_v58, %v4516_v58  ;;  %v1409_v2 = vmul.f32 %v4518_v60, %v4518_v60  ;;  %v1406_v3 = vmul.f32 %v4520_v14, %v4520_v14  ;;  %v1408_v38 = vmul.f32 %v4522_v61, %v4522_v61  ;;  %v111_v51 = vld [vmem:[%s5366_s10 + $0x48] sm:$0xff] }
 0x374   :  { %1440 = vmatprep.subr.mxu0 %v1403_v22  ;;  %1511 = vmatprep.subr.mxu1 %v1405_v62  ;;  %v143_v22 = vld [vmem:[%s5366_s10 + $0x148] sm:$0xff]  ;;  %v126_v62 = vld [vmem:[%s5366_s10 + $0xc0] sm:$0xff] }
 0x375   :  { %1441 = vmatpush1.msra.mxu0 %v1402_v35  ;;  %1512 = vmatpush1.msra.mxu1 %v1404_v63  ;;  %v158_v35 = vld [vmem:[%s5366_s10 + $0x1c0] sm:$0xff] }
 0x376   :  { %3628 = vmatmul.mubr.msk.f32.vlgmr.msra.gmra.mxu0 %vm1096_vm12, %v4470_v9  ;;  %1582 = vmatprep.subr.mxu0 %v1407_v1  ;;  %v110_v63 = vld [vmem:[%s5366_s10 + $0x40] sm:$0xff] }
 0x377   :  { %1653 = vmatprep.subr.mxu1 %v1409_v2  ;;  %3629 = vmatmul.mubr.msk.f32.vlgmr.msra.gmra.mxu1 %vm1096_vm12, %v4470_v9  ;;  %v142_v1 = vld [vmem:[%s5366_s10 + $0x140] sm:$0xff]  ;;  %v125_v2 = vld [vmem:[%s5366_s10 + $0xb8] sm:$0xff] }
 0x378   :  { %1583 = vmatpush1.msra.mxu0 %v1406_v3  ;;  %1654 = vmatpush1.msra.mxu1 %v1408_v38  ;;  %v157_v3 = vld [vmem:[%s5366_s10 + $0x1b8] sm:$0xff] }
 0x379   :  { %1616 = vmatprep.mubr.f32.mxu0 %v3984_v5  ;;  %1687 = vmatprep.mubr.f32.mxu1 %v3984_v5  ;;  %v109_v38 = vld [vmem:[%s5366_s10 + $0x38] sm:$0xff] }
 0x37a   :  { %3630 = vmatmul.mubr.msk.f32.vlgmr.msra.gmra.mxu0 %vm1096_vm12, %v4470_v9  ;;  %3660 = vmatprep.subr.mxu0 %v133_v16  ;;  %v138_v16 = vld [vmem:[%s5366_s10 + $0x120] sm:$0xff] }
 0x37b   :  { %3631 = vmatmul.mubr.msk.f32.vlgmr.msra.gmra.mxu1 %vm1096_vm12, %v4470_v9  ;;  %v95_v9 = vld [vmem:[%s5362_s6] sm:$0xff]  ;;  %3695 = vmatprep.subr.mxu1 %v165_v21  ;;  %v121_v21 = vld [vmem:[%s5366_s10 + $0x98] sm:$0xff]  ;;  %s5390_s6 = sld [smem:[#allocation10_spill]] }
 0x37c   :  { %3661 = vmatpush3.msra.mxu0 %v117_v53  ;;  %3696 = vmatpush3.msra.mxu1 %v149_v24  ;;  %v153_v53 = vld [vmem:[%s5366_s10 + $0x198] sm:$0xff] }
 0x37d   :  { %3662 = vmatprep.subr.mxu0 %v132_v25  ;;  %3697 = vmatprep.subr.mxu1 %v164_v59  ;;  %v105_v24 = vld [vmem:[%s5366_s10 + $0x18] sm:$0xff] }
 0x37e   :  { %3663 = vmatpush3.msra.mxu0 %v116_v6  ;;  %3698 = vmatpush3.msra.mxu1 %v148_v26  ;;  %v137_v25 = vld [vmem:[%s5366_s10 + $0x118] sm:$0xff]  ;;  %v120_v6 = vld [vmem:[%s5366_s10 + $0x90] sm:$0xff] }
 0x37f   :  { %3664 = vmatprep.subr.mxu0 %v131_v8  ;;  %3699 = vmatprep.subr.mxu1 %v163_v30  ;;  %v152_v26 = vld [vmem:[%s5366_s10 + $0x190] sm:$0xff] }
 0x380   :  { %3665 = vmatpush3.msra.mxu0 %v115_v31  ;;  %3700 = vmatpush3.msra.mxu1 %v147_v32  ;;  %v104_v8 = vld [vmem:[%s5366_s10 + $0x10] sm:$0xff]  ;;  %v119_v32 = vld [vmem:[%s5366_s10 + $0x88] sm:$0xff] }
 0x381   :  { %3666 = vmatprep.subr.mxu0 %v130_v33  ;;  %3701 = vmatprep.subr.mxu1 %v162_v34  ;;  %v136_v31 = vld [vmem:[%s5366_s10 + $0x110] sm:$0xff]  ;;  %v151_v33 = vld [vmem:[%s5366_s10 + $0x188] sm:$0xff] }
 0x382   :  { %3667 = vmatpush3.msra.mxu0 %v114_v36  ;;  %3702 = vmatpush3.msra.mxu1 %v146_v37  ;;  %v103_v34 = vld [vmem:[%s5366_s10 + $0x8] sm:$0xff]  ;;  %v118_v37 = vld [vmem:[%s5366_s10 + $0x80] sm:$0xff] }
 0x383   :  { %3668 = vmatprep.subr.mxu0 %v129_v39  ;;  %3703 = vmatprep.subr.mxu1 %v161_v40  ;;  %v135_v36 = vld [vmem:[%s5366_s10 + $0x108] sm:$0xff]  ;;  %v150_v39 = vld [vmem:[%s5366_s10 + $0x180] sm:$0xff] }
 0x384   :  { %3669 = vmatpush3.msra.mxu0 %v113_v41  ;;  %3704 = vmatpush3.msra.mxu1 %v145_v42  ;;  %v102_v40 = vld [vmem:[%s5366_s10] sm:$0xff]  ;;  %v197_v42 = vld [vmem:[%s5366_s10 + $0x2f8] sm:$0xff] }
 0x385   :  { %3670 = vmatprep.subr.mxu0 %v128_v45  ;;  %3705 = vmatprep.subr.mxu1 %v160_v46  ;;  %v134_v41 = vld [vmem:[%s5366_s10 + $0x100] sm:$0xff]  ;;  %v229_v45 = vld [vmem:[%s5366_s10 + $0x3f8] sm:$0xff] }
 0x386   :  { %3671 = vmatpush3.msra.mxu0 %v112_v48  ;;  %3706 = vmatpush3.msra.mxu1 %v144_v49 }
 0x387   :  { %3672 = vmatprep.subr.mxu0 %v127_v50  ;;  %3707 = vmatprep.subr.mxu1 %v159_v12 }
 0x388   :  { %3673 = vmatpush3.msra.mxu0 %v111_v51  ;;  %3708 = vmatpush3.msra.mxu1 %v143_v22 }
 0x389   :  { %3674 = vmatprep.subr.mxu0 %v126_v62  ;;  %3709 = vmatprep.subr.mxu1 %v158_v35 }
 0x38a   :  { %3675 = vmatpush3.msra.mxu0 %v110_v63  ;;  %3710 = vmatpush3.msra.mxu1 %v142_v1 }
 0x38b   :  { %3676 = vmatprep.subr.mxu0 %v125_v2  ;;  %3711 = vmatprep.subr.mxu1 %v157_v3 }
 0x38c   :  { %3677 = vmatpush3.msra.mxu0 %v109_v38 }
 0x436   :  { %v1476_v29 = vpop.f32.mrf.mxu0 }
 0x437   :  { %v1547_v11 = vpop.f32.mrf.mxu1 }
 0x438   :  { %v1478_v10 = vpop.f32.mrf.mxu0 }
 0x439   :  { %v1694_v27 = vadd.f32 %v1478_v10, %v1476_v29  ;;  %v1549_v52 = vpop.f32.mrf.mxu1  ;;  %v141_v29 = vld [vmem:[%s5366_s10 + $0x138] sm:$0xff]  ;;  %v124_v10 = vld [vmem:[%s5366_s10 + $0xb0] sm:$0xff] }
 0x43a   :  { %v1618_v56 = vpop.f32.mrf.mxu0  ;;  %3712 = vmatpush3.msra.mxu1 %v141_v29  ;;  %3678 = vmatprep.subr.mxu0 %v124_v10 }
 0x43b   :  { %v1695_v28 = vadd.f32 %v1694_v27, %v1547_v11  ;;  %v1689_v20 = vpop.f32.mrf.mxu1  ;;  %v156_v11 = vld [vmem:[%s5366_s10 + $0x1b0] sm:$0xff] }
 0x43c   :  { %v1620_v43 = vpop.f32.mrf.mxu0  ;;  %v108_v27 = vld [vmem:[%s5366_s10 + $0x30] sm:$0xff]  ;;  %3713 = vmatprep.subr.mxu1 %v156_v11 }
 0x43d   :  { %v1696_v18 = vadd.f32 %v1695_v28, %v1549_v52  ;;  %v1691_v44 = vpop.f32.mrf.mxu1  ;;  %v140_v28 = vld [vmem:[%s5366_s10 + $0x130] sm:$0xff]  ;;  %v123_v52 = vld [vmem:[%s5366_s10 + $0xa8] sm:$0xff]  ;;  %3679 = vmatpush3.msra.mxu0 %v108_v27 }
 0x43e   :  { %3714 = vmatpush3.msra.mxu1 %v140_v28  ;;  %3680 = vmatprep.subr.mxu0 %v123_v52 }
 0x43f   :  { %v1697_v19 = vadd.f32 %v1696_v18, %v1618_v56  ;;  %v155_v56 = vld [vmem:[%s5366_s10 + $0x1a8] sm:$0xff] }
 0x440   :  { %v107_v18 = vld [vmem:[%s5366_s10 + $0x28] sm:$0xff]  ;;  %3715 = vmatprep.subr.mxu1 %v155_v56 }
 0x441   :  { %v1698_v4 = vadd.f32 %v1697_v19, %v1620_v43  ;;  %v139_v19 = vld [vmem:[%s5366_s10 + $0x128] sm:$0xff]  ;;  %v122_v43 = vld [vmem:[%s5366_s10 + $0xa0] sm:$0xff]  ;;  %3681 = vmatpush3.msra.mxu0 %v107_v18  ;;  %v181_v18 = vld [vmem:[%s5366_s10 + $0x278] sm:$0xff] }
 0x442   :  { %3716 = vmatpush3.msra.mxu1 %v139_v19  ;;  %3682 = vmatprep.subr.mxu0 %v122_v43  ;;  %v213_v19 = vld [vmem:[%s5366_s10 + $0x378] sm:$0xff] }
 0x443   :  { %v1699_v7 = vadd.f32 %v1698_v4, %v1689_v20  ;;  %v154_v20 = vld [vmem:[%s5366_s10 + $0x1a0] sm:$0xff] }
 0x444   :  { %3717 = vmatprep.subr.mxu1 %v154_v20  ;;  %v196_v20 = vld [vmem:[%s5366_s10 + $0x2f0] sm:$0xff] }
 0x445   :  { %v1700_v47 = vadd.f32 %v1699_v7, %v1691_v44  ;;  %3718 = vmatpush3.msra.mxu1 %v138_v16  ;;  %v212_v16 = vld [vmem:[%s5366_s10 + $0x370] sm:$0xff] }
 0x446   :  { %3719 = vmatprep.subr.mxu1 %v153_v53  ;;  %v195_v53 = vld [vmem:[%s5366_s10 + $0x2e8] sm:$0xff] }
 0x447   :  { %1701 = vadd.xlane.f32.xlu1 %v1700_v47  ;;  %v94_v47 = vld [vmem:[%s5361_s5] sm:$0xff]  ;;  %3720 = vmatpush3.msra.mxu1 %v137_v25  ;;  %v179_v25 = vld [vmem:[%s5366_s10 + $0x268] sm:$0xff]  ;;  %s3992_s5 = smov 112  }
 0x448   :  { %3721 = vmatprep.subr.mxu1 %v152_v26  ;;  %v226_v26 = vld [vmem:[%s5366_s10 + $0x3e0] sm:$0xff] }
 0x449   :  { %3722 = vmatpush3.msra.mxu1 %v136_v31  ;;  %v193_v31 = vld [vmem:[%s5366_s10 + $0x2d8] sm:$0xff] }
 0x44a   :  { %3723 = vmatprep.subr.mxu1 %v151_v33  ;;  %v177_v33 = vld [vmem:[%s5366_s10 + $0x258] sm:$0xff] }
 0x44b   :  { %3724 = vmatpush3.msra.mxu1 %v135_v36  ;;  %v192_v36 = vld [vmem:[%s5366_s10 + $0x2d0] sm:$0xff] }
 0x44c   :  { %3725 = vmatprep.subr.mxu1 %v150_v39  ;;  %v176_v39 = vld [vmem:[%s5366_s10 + $0x250] sm:$0xff] }
 0x44d   :  { %3726 = vmatpush3.msra.mxu1 %v134_v41  ;;  %v191_v41 = vld [vmem:[%s5366_s10 + $0x2c8] sm:$0xff] }
 0x44e   :  { %3765 = vmatprep.subr.mxu1 %v229_v45  ;;  %v175_v45 = vld [vmem:[%s5366_s10 + $0x248] sm:$0xff] }
 0x458   :  { %1722 = vperm.xlu1 %3921, %v95_v9   ;;  %v106_v9 = vld [vmem:[%s5366_s10 + $0x20] sm:$0xff] }
 0x459   :  { %3683 = vmatpush3.msra.mxu0 %v106_v9 }
 0x45a   :  { %3684 = vmatprep.subr.mxu0 %v121_v21 }
 0x45b   :  { %3685 = vmatpush3.msra.mxu0 %v105_v24  ;;  %v227_v24 = vld [vmem:[%s5366_s10 + $0x3e8] sm:$0xff] }
 0x45c   :  { %3686 = vmatprep.subr.mxu0 %v120_v6  ;;  %v194_v6 = vld [vmem:[%s5366_s10 + $0x2e0] sm:$0xff] }
 0x45d   :  { %3687 = vmatpush3.msra.mxu0 %v104_v8  ;;  %v178_v8 = vld [vmem:[%s5366_s10 + $0x260] sm:$0xff] }
 0x45e   :  { %3688 = vmatprep.subr.mxu0 %v119_v32  ;;  %v225_v32 = vld [vmem:[%s5366_s10 + $0x3d8] sm:$0xff] }
 0x45f   :  { %3689 = vmatpush3.msra.mxu0 %v103_v34  ;;  %v209_v34 = vld [vmem:[%s5366_s10 + $0x358] sm:$0xff] }
 0x460   :  { %3690 = vmatprep.subr.mxu0 %v118_v37  ;;  %v224_v37 = vld [vmem:[%s5366_s10 + $0x3d0] sm:$0xff] }
 0x461   :  { %3691 = vmatpush3.msra.mxu0 %v102_v40  ;;  %v208_v40 = vld [vmem:[%s5366_s10 + $0x350] sm:$0xff] }
 0x462   :  { %3730 = vmatprep.subr.mxu0 %v197_v42  ;;  %v223_v42 = vld [vmem:[%s5366_s10 + $0x3c8] sm:$0xff] }
 0x4d0   :  { %v1702_v4 = vpop.xlane.xlu1 %1701 }
 0x4d1   :  { %v1703_v7 = vmul.f32 0.00048828125, %v1702_v4 }
 0x4d3   :  { %v1704_v44 = vadd.f32 1e-05, %v1703_v7 }
 0x4d4   :  { %v4756_v48 = vpop.permute.xlu1 %1722 }
 0x4d5   :  { %3927 = vrsqrt.f32 %v1704_v44  ;;  %v228_v44 = vld [vmem:[%s5366_s10 + $0x3f0] sm:$0xff] }
 0x4e2   :  { %v3928_v59 = vpop.eup %3927 }
 0x4e3   :  { %v1706_v30 = vmul.f32 %v3928_v59, %v94_v47  ;;  %v180_v47 = vld [vmem:[%s5366_s10 + $0x270] sm:$0xff]  ;;  %v211_v59 = vld [vmem:[%s5366_s10 + $0x368] sm:$0xff] }
 0x4e5   :  { %1709 = vperm.xlu0 %3920, %v1706_v30   ;;  %v210_v30 = vld [vmem:[%s5366_s10 + $0x360] sm:$0xff] }
 0x560   :  { %v4754_v46 = vpop.permute.xlu0 %1709 }
 0x561   :  { %v1713_v49 = vmul.f32 %v4754_v46, %v4506_v54  ;;  %v1715_v50 = vmul.f32 %v4754_v46, %v4509_v55  ;;  %v1712_v12 = vmul.f32 %v4754_v46, %v4511_v57  ;;  %v1714_v51 = vmul.f32 %v4754_v46, %v4514_v23 }
 0x562   :  { %v1717_v22 = vmul.f32 %v4754_v46, %v4516_v58  ;;  %v1719_v62 = vmul.f32 %v4754_v46, %v4518_v60 }
 0x563   :  { %v1726_v35 = vadd.f32 %v4756_v48, %v1713_v49  ;;  %v1728_v63 = vadd.f32 %v4756_v48, %v1715_v50  ;;  %v1725_v54 = vadd.f32 %v4756_v48, %v1712_v12  ;;  %v1727_v55 = vadd.f32 %v4756_v48, %v1714_v51  ;;  %v207_v49 = vld [vmem:[%s5366_s10 + $0x348] sm:$0xff]  ;;  %v190_v50 = vld [vmem:[%s5366_s10 + $0x2c0] sm:$0xff] }
 0x564   :  { %v1730_v1 = vadd.f32 %v4756_v48, %v1717_v22  ;;  %v1732_v57 = vadd.f32 %v4756_v48, %v1719_v62  ;;  %v222_v12 = vld [vmem:[%s5366_s10 + $0x3c0] sm:$0xff]  ;;  %v189_v62 = vld [vmem:[%s5366_s10 + $0x2b8] sm:$0xff] }
 0x565   :  { %vm1734_vm13 = vcmp.gt.f32.partialorder %v1726_v35, 0.0  ;;  %v1742_v23 = vmul.f32 0.1, %v1726_v35  ;;  %vm1736_vm14 = vcmp.gt.f32.partialorder %v1728_v63, 0.0  ;;  %v1744_v2 = vmul.f32 0.1, %v1728_v63 }
 0x566   :  { %vm1733_vm15 = vcmp.gt.f32.partialorder %v1725_v54, 0.0  ;;  %v1741_v58 = vmul.f32 0.1, %v1725_v54  ;;  %vm1735_vm0 = vcmp.gt.f32.partialorder %v1727_v55, 0.0  ;;  %v1743_v60 = vmul.f32 0.1, %v1727_v55 }
 0x567   :  { %v4776_v3 = vsel %vm1734_vm13, %v1726_v35, %v1742_v23  ;;  %v4778_v38 = vsel %vm1736_vm14, %v1728_v63, %v1744_v2  ;;  %vm1738_vm3 = vcmp.gt.f32.partialorder %v1730_v1, 0.0  ;;  %v1746_v29 = vmul.f32 0.1, %v1730_v1  ;;  %v174_v51 = vld [vmem:[%s5366_s10 + $0x240] sm:$0xff]  ;;  %v221_v35 = vld [vmem:[%s5366_s10 + $0x3b8] sm:$0xff]  ;;  %v172_v2 = vld [vmem:[%s5366_s10 + $0x230] sm:$0xff] }
 0x568   :  { %v1758_v10 = vmul.f32 %v4776_v3, %v4776_v3  ;;  %v1760_v11 = vmul.f32 %v4778_v38, %v4778_v38  ;;  %v4784_v27 = vsel %vm1733_vm15, %v1725_v54, %v1741_v58  ;;  %v4786_v28 = vsel %vm1735_vm0, %v1727_v55, %v1743_v60  ;;  %v206_v22 = vld [vmem:[%s5366_s10 + $0x340] sm:$0xff]  ;;  %v173_v63 = vld [vmem:[%s5366_s10 + $0x238] sm:$0xff]  ;;  %v188_v55 = vld [vmem:[%s5366_s10 + $0x2b0] sm:$0xff] }
 0x569   :  { %v1757_v52 = vmul.f32 %v4784_v27, %v4784_v27  ;;  %v1759_v56 = vmul.f32 %v4786_v28, %v4786_v28  ;;  %v4798_v43 = vsel %vm1738_vm3, %v1730_v1, %v1746_v29  ;;  %vm1740_vm4 = vcmp.gt.f32.partialorder %v1732_v57, 0.0  ;;  %v205_v54 = vld [vmem:[%s5366_s10 + $0x338] sm:$0xff]  ;;  %v220_v1 = vld [vmem:[%s5366_s10 + $0x3b0] sm:$0xff]  ;;  %v187_v60 = vld [vmem:[%s5366_s10 + $0x2a8] sm:$0xff] }
 0x56a   :  { %1829 = vmatprep.mubr.f32.mxu0 %v1758_v10  ;;  %1899 = vmatprep.mubr.f32.mxu1 %v1760_v11  ;;  %v1748_v4 = vmul.f32 0.1, %v1732_v57  ;;  %v1762_v7 = vmul.f32 %v4798_v43, %v4798_v43  ;;  %v1718_v23 = vmul.f32 %v4754_v46, %v4522_v61  ;;  %v204_v58 = vld [vmem:[%s5366_s10 + $0x330] sm:$0xff]  ;;  %v171_v61 = vld [vmem:[%s5366_s10 + $0x228] sm:$0xff]  ;;  %v186_v29 = vld [vmem:[%s5366_s10 + $0x2a0] sm:$0xff]  ;;  %vm2916_vm0 = vcmp.lt.s32.totalorder %v4214_v15, 15 }
 0x56b   :  { %1830 = vmatmul.mubr.f32.vlgmr.msra.gmra.mxu0 %v1757_v52  ;;  %1900 = vmatmul.mubr.f32.vlgmr.msra.gmra.mxu1 %v1759_v56  ;;  %v218_v10 = vld [vmem:[%s5366_s10 + $0x3a0] sm:$0xff] }
 0x56c   :  { %3731 = vmatpush3.msra.mxu0 %v181_v18  ;;  %3766 = vmatpush3.msra.mxu1 %v213_v19  ;;  %v4811_v9 = vsel %vm1740_vm4, %v1732_v57, %v1748_v4  ;;  %v1716_v57 = vmul.f32 %v4754_v46, %v4520_v14  ;;  %v219_v14 = vld [vmem:[%s5366_s10 + $0x3a8] sm:$0xff]  ;;  %v1731_v52 = vadd.f32 %v4756_v48, %v1718_v23  ;;  %v170_v56 = vld [vmem:[%s5366_s10 + $0x220] sm:$0xff]  ;;  %v185_v19 = vld [vmem:[%s5366_s10 + $0x298] sm:$0xff] }
 0x56d   :  { %3732 = vmatprep.subr.mxu0 %v196_v20  ;;  %1969 = vmatprep.mubr.f32.mxu0 %v1762_v7  ;;  %v1764_v21 = vmul.f32 %v4811_v9, %v4811_v9  ;;  %v203_v46 = vld [vmem:[%s5366_s10 + $0x328] sm:$0xff]  ;;  %v202_v18 = vld [vmem:[%s5366_s10 + $0x320] sm:$0xff]  ;;  %v169_v20 = vld [vmem:[%s5366_s10 + $0x218] sm:$0xff] }
 0x56e   :  { %3767 = vmatprep.subr.mxu1 %v228_v44  ;;  %3733 = vmatpush3.msra.mxu0 %v180_v47  ;;  %v1729_v11 = vadd.f32 %v4756_v48, %v1716_v57  ;;  %v217_v48 = vld [vmem:[%s5366_s10 + $0x398] sm:$0xff]  ;;  %v184_v7 = vld [vmem:[%s5366_s10 + $0x290] sm:$0xff]  ;;  %vm1739_vm8 = vcmp.gt.f32.partialorder %v1731_v52, 0.0 }
 0x56f   :  { %2039 = vmatprep.mubr.f32.mxu1 %v1764_v21  ;;  %3768 = vmatpush3.msra.mxu1 %v212_v16  ;;  %v201_v4 = vld [vmem:[%s5366_s10 + $0x318] sm:$0xff]  ;;  %v216_v44 = vld [vmem:[%s5366_s10 + $0x390] sm:$0xff]  ;;  %v1747_v16 = vmul.f32 0.1, %v1731_v52 }
 0x570   :  { %3734 = vmatprep.subr.mxu0 %v195_v53  ;;  %3769 = vmatprep.subr.mxu1 %v227_v24  ;;  %v1745_v47 = vmul.f32 0.1, %v1729_v11  ;;  %v168_v21 = vld [vmem:[%s5366_s10 + $0x210] sm:$0xff]  ;;  %vm1737_vm5 = vcmp.gt.f32.partialorder %v1729_v11, 0.0  ;;  %v183_v24 = vld [vmem:[%s5366_s10 + $0x288] sm:$0xff] }
 0x571   :  { %3735 = vmatpush3.msra.mxu0 %v179_v25  ;;  %3770 = vmatpush3.msra.mxu1 %v211_v59  ;;  %v200_v53 = vld [vmem:[%s5366_s10 + $0x310] sm:$0xff]  ;;  %v215_v25 = vld [vmem:[%s5366_s10 + $0x388] sm:$0xff] }
 0x572   :  { %3736 = vmatprep.subr.mxu0 %v194_v6  ;;  %3771 = vmatprep.subr.mxu1 %v226_v26  ;;  %v167_v59 = vld [vmem:[%s5366_s10 + $0x208] sm:$0xff]  ;;  %v182_v26 = vld [vmem:[%s5366_s10 + $0x280] sm:$0xff] }
 0x573   :  { %3737 = vmatpush3.msra.mxu0 %v178_v8  ;;  %3772 = vmatpush3.msra.mxu1 %v210_v30  ;;  %v199_v6 = vld [vmem:[%s5366_s10 + $0x308] sm:$0xff]  ;;  %v214_v8 = vld [vmem:[%s5366_s10 + $0x380] sm:$0xff]  ;;  %v4986_v30 = vsel %vm1737_vm5, %v1729_v11, %v1745_v47  ;;  %v101_v11 = vld [vmem:[%s5365_s9 + $0x18] sm:$0xff]  ;;  %vm2889_vm5 = vcmp.lt.s32.totalorder %v4214_v15, 113 }
 0x574   :  { %3738 = vmatprep.subr.mxu0 %v193_v31  ;;  %3773 = vmatprep.subr.mxu1 %v225_v32  ;;  %v4988_v31 = vsel %vm1739_vm8, %v1731_v52, %v1747_v16  ;;  %v166_v32 = vld [vmem:[%s5366_s10 + $0x200] sm:$0xff]  ;;  %v259_v47 = vld [vmem:[#allocation2 + $0xe8] sm:$0xff] }
 0x575   :  { %3739 = vmatpush3.msra.mxu0 %v177_v33  ;;  %3774 = vmatpush3.msra.mxu1 %v209_v34  ;;  %v198_v33 = vld [vmem:[%s5366_s10 + $0x300] sm:$0xff]  ;;  %v1761_v34 = vmul.f32 %v4986_v30, %v4986_v30  ;;  %v323_v16 = vld [vmem:[#allocation2 + $0x2e8] sm:$0xff] }
 0x576   :  { %3740 = vmatprep.subr.mxu0 %v192_v36  ;;  %3775 = vmatprep.subr.mxu1 %v224_v37  ;;  %v1763_v36 = vmul.f32 %v4988_v31, %v4988_v31 }
 0x577   :  { %3741 = vmatpush3.msra.mxu0 %v176_v39  ;;  %3776 = vmatpush3.msra.mxu1 %v208_v40 }
 0x578   :  { %3742 = vmatprep.subr.mxu0 %v191_v41  ;;  %3777 = vmatprep.subr.mxu1 %v223_v42 }
 0x579   :  { %3743 = vmatpush3.msra.mxu0 %v175_v45  ;;  %3778 = vmatpush3.msra.mxu1 %v207_v49 }
 0x57a   :  { %3744 = vmatprep.subr.mxu0 %v190_v50  ;;  %3779 = vmatprep.subr.mxu1 %v222_v12 }
 0x57b   :  { %3745 = vmatpush3.msra.mxu0 %v174_v51  ;;  %3780 = vmatpush3.msra.mxu1 %v206_v22 }
 0x57c   :  { %3746 = vmatprep.subr.mxu0 %v189_v62  ;;  %3781 = vmatprep.subr.mxu1 %v221_v35 }
 0x57d   :  { %3747 = vmatpush3.msra.mxu0 %v173_v63  ;;  %3782 = vmatpush3.msra.mxu1 %v205_v54 }
 0x57e   :  { %3748 = vmatprep.subr.mxu0 %v188_v55  ;;  %3783 = vmatprep.subr.mxu1 %v220_v1  ;;  %v81_v55 = vld [vmem:[%s5390_s6] sm:$0xff] }
 0x57f   :  { %3749 = vmatpush3.msra.mxu0 %v172_v2  ;;  %3784 = vmatpush3.msra.mxu1 %v204_v58  ;;  %v82_v2 = vld [vmem:[%s5391_s21] sm:$0xf] }
 0x580   :  { %3750 = vmatprep.subr.mxu0 %v187_v60  ;;  %3785 = vmatprep.subr.mxu1 %v219_v14  ;;  %v98_v14 = vld [vmem:[%s5365_s9] sm:$0xff] }
 0x581   :  { %3751 = vmatpush3.msra.mxu0 %v171_v61  ;;  %3786 = vmatpush3.msra.mxu1 %v203_v46  ;;  %v99_v61 = vld [vmem:[%s5365_s9 + $0x8] sm:$0xff]  ;;  %v2208_v46 = vcombine.high %v98_v14, %v98_v14 }
 0x582   :  { %3752 = vmatprep.subr.mxu0 %v186_v29  ;;  %3787 = vmatprep.subr.mxu1 %v218_v10  ;;  %v2209_v29 = vcombine.high %v99_v61, %v99_v61  ;;  %v100_v10 = vld [vmem:[%s5365_s9 + $0x10] sm:$0xff]  ;;  %s3990_s9 = smov 15  }
 0x583   :  { %3753 = vmatpush3.msra.mxu0 %v170_v56  ;;  %3788 = vmatpush3.msra.mxu1 %v202_v18  ;;  %v2210_v52 = vcombine.high %v100_v10, %v100_v10  ;;  %v2211_v56 = vcombine.high %v101_v11, %v101_v11 }
 0x584   :  { %3754 = vmatprep.subr.mxu0 %v185_v19  ;;  %3789 = vmatprep.subr.mxu1 %v217_v48 }
 0x585   :  { %3755 = vmatpush3.msra.mxu0 %v169_v20  ;;  %3790 = vmatpush3.msra.mxu1 %v201_v4  ;;  %v261_v20 = vld [vmem:[#allocation2 + $0xf8] sm:$0xff] }
 0x586   :  { %3756 = vmatprep.subr.mxu0 %v184_v7  ;;  %3791 = vmatprep.subr.mxu1 %v216_v44  ;;  %v325_v4 = vld [vmem:[#allocation2 + $0x2f8] sm:$0xff]  ;;  %v260_v7 = vld [vmem:[#allocation2 + $0xf0] sm:$0xff] }
 0x587   :  { %3757 = vmatpush3.msra.mxu0 %v168_v21  ;;  %3792 = vmatpush3.msra.mxu1 %v200_v53  ;;  %v324_v44 = vld [vmem:[#allocation2 + $0x2f0] sm:$0xff]  ;;  %v258_v21 = vld [vmem:[#allocation2 + $0xe0] sm:$0xff] }
 0x588   :  { %3758 = vmatprep.subr.mxu0 %v183_v24  ;;  %3793 = vmatprep.subr.mxu1 %v215_v25  ;;  %v322_v53 = vld [vmem:[#allocation2 + $0x2e0] sm:$0xff]  ;;  %v257_v24 = vld [vmem:[#allocation2 + $0xd8] sm:$0xff] }
 0x589   :  { %3759 = vmatpush3.msra.mxu0 %v167_v59  ;;  %3794 = vmatpush3.msra.mxu1 %v199_v6  ;;  %v321_v25 = vld [vmem:[#allocation2 + $0x2d8] sm:$0xff]  ;;  %v256_v59 = vld [vmem:[#allocation2 + $0xd0] sm:$0xff] }
 0x58a   :  { %3760 = vmatprep.subr.mxu0 %v182_v26  ;;  %3795 = vmatprep.subr.mxu1 %v214_v8  ;;  %v320_v6 = vld [vmem:[#allocation2 + $0x2d0] sm:$0xff]  ;;  %v255_v26 = vld [vmem:[#allocation2 + $0xc8] sm:$0xff] }
 0x58b   :  { %3761 = vmatpush3.msra.mxu0 %v166_v32  ;;  %3796 = vmatpush3.msra.mxu1 %v198_v33  ;;  %v319_v8 = vld [vmem:[#allocation2 + $0x2c8] sm:$0xff]  ;;  %v254_v32 = vld [vmem:[#allocation2 + $0xc0] sm:$0xff] }
 0x58c   :  { %1970 = vmatmul.mubr.f32.vlgmr.msra.gmra.mxu0 %v1761_v34  ;;  %2040 = vmatmul.mubr.f32.vlgmr.msra.gmra.mxu1 %v1763_v36  ;;  %v318_v33 = vld [vmem:[#allocation2 + $0x2c0] sm:$0xff]  ;;  %v253_v34 = vld [vmem:[#allocation2 + $0xb8] sm:$0xff] }
 0x58d   :  { %3878 = vmatprep.subr.mxu0 %v3984_v5  ;;  %3883 = vmatprep.subr.mxu1 %v3984_v5  ;;  %v317_v36 = vld [vmem:[#allocation2 + $0x2b8] sm:$0xff] }
 0x58e   :  { %3880 = vmatprep.mubr.msk.f32.mxu0 %vm3989_vm9, %v3984_v5  ;;  %3885 = vmatprep.mubr.msk.f32.mxu1 %vm3989_vm9, %v3984_v5 }
 0x58f   :  { %3884 = vmatpush3.msk.msra.mxu1 %vm2128_vm2, %v82_v2  ;;  %v307_v2 = vld [vmem:[#allocation2 + $0x268] sm:$0xff] }
 0x590   :  { %3639 = vmatprep.subr.msk.mxu1 %vm2128_vm2, %v2209_v29  ;;  %v304_v29 = vld [vmem:[#allocation2 + $0x250] sm:$0xff] }
 0x62b   :  { %v3692_v37 = vpop.f32.mrf.mxu0  ;;  %v3727_v39 = vpop.f32.mrf.mxu1 }
 0x62d   :  { %v3693_v40 = vpop.f32.mrf.mxu0  ;;  %v3728_v41 = vpop.f32.mrf.mxu1 }
 0x62e   :  { %v3694_v42 = vadd.f32 %v3693_v40, %v3692_v37  ;;  %v3729_v45 = vadd.f32 %v3728_v41, %v3727_v39  ;;  %v252_v37 = vld [vmem:[#allocation2 + $0xb0] sm:$0xff]  ;;  %v251_v40 = vld [vmem:[#allocation2 + $0xa8] sm:$0xff] }
 0x62f   :  { %v316_v39 = vld [vmem:[#allocation2 + $0x2b0] sm:$0xff]  ;;  %v315_v41 = vld [vmem:[#allocation2 + $0x2a8] sm:$0xff] }
 0x630   :  { %v1902_v22 = vadd.f32 %v3729_v45, %v3694_v42  ;;  %v250_v42 = vld [vmem:[#allocation2 + $0xa0] sm:$0xff] }
 0x631   :  { %v314_v45 = vld [vmem:[#allocation2 + $0x2a0] sm:$0xff] }
 0x64c   :  { %v3762_v49 = vpop.f32.mrf.mxu0  ;;  %v3797_v50 = vpop.f32.mrf.mxu1 }
 0x64e   :  { %v3763_v12 = vpop.f32.mrf.mxu0  ;;  %v3798_v51 = vpop.f32.mrf.mxu1 }
 0x64f   :  { %v3764_v62 = vadd.f32 %v3763_v12, %v3762_v49  ;;  %v3799_v63 = vadd.f32 %v3798_v51, %v3797_v50  ;;  %v249_v49 = vld [vmem:[#allocation2 + $0x98] sm:$0xff]  ;;  %v248_v12 = vld [vmem:[#allocation2 + $0x90] sm:$0xff] }
 0x650   :  { %v313_v50 = vld [vmem:[#allocation2 + $0x298] sm:$0xff]  ;;  %v312_v51 = vld [vmem:[#allocation2 + $0x290] sm:$0xff] }
 0x651   :  { %v1972_v35 = vadd.f32 %v3764_v62, %v1902_v22  ;;  %v247_v22 = vld [vmem:[#allocation2 + $0x88] sm:$0xff] }
 0x652   :  { %v311_v62 = vld [vmem:[#allocation2 + $0x288] sm:$0xff] }
 0x653   :  { %v2042_v54 = vadd.f32 %v3799_v63, %v1972_v35  ;;  %v246_v35 = vld [vmem:[#allocation2 + $0x80] sm:$0xff] }
 0x654   :  { %v310_v63 = vld [vmem:[#allocation2 + $0x280] sm:$0xff] }
 0x655   :  { %3879 = vmatpush3.msra.mxu0 %v2042_v54  ;;  %v245_v54 = vld [vmem:[#allocation2 + $0x78] sm:$0xff] }
 0x656   :  { %3881 = vmatmul.mubr.msk.f32.vlgmr.msra.gmra.mxu0 %vm1096_vm12, %v81_v55  ;;  %3636 = vmatprep.subr.msk.mxu0 %vm2128_vm2, %v2208_v46  ;;  %v309_v55 = vld [vmem:[#allocation2 + $0x278] sm:$0xff]  ;;  %v240_v46 = vld [vmem:[#allocation2 + $0x50] sm:$0xff] }
 0x657   :  { %2295 = vmatprep.mubr.f32.mxu0 %v3984_v5  ;;  %3637 = vmatpush1.msk.msra.mxu0 %vm2128_vm2, %v98_v14  ;;  %v241_v14 = vld [vmem:[#allocation2 + $0x58] sm:$0xff] }
 0x658   :  { %3642 = vmatprep.subr.msk.mxu0 %vm2128_vm2, %v2210_v52  ;;  %v238_v52 = vld [vmem:[#allocation2 + $0x40] sm:$0xff] }
 0x716   :  { %v2114_v1 = vpop.f32.mrf.mxu0 }
 0x717   :  { %v2119_v57 = vsel %vm2118_vm11, %v2114_v1, -inf }
 0x718   :  { %2120 = vmax.xlane.f32.xlu1 %v2119_v57  ;;  %v3882_v23 = vpop.f32.mrf.mxu0  ;;  %v308_v57 = vld [vmem:[#allocation2 + $0x270] sm:$0xff] }
 0x719   :  { %v243_v23 = vld [vmem:[#allocation2 + $0x68] sm:$0xff] }
 0x7a1   :  { %v2121_v58 = vpop.xlane.xlu1 %2120 }
 0x7a2   :  { %vm2122_vm7 = vcmp.ge.f32.partialorder %v2114_v1, %v2121_v58  ;;  %v244_v1 = vld [vmem:[#allocation2 + $0x70] sm:$0xff]  ;;  %v242_v58 = vld [vmem:[#allocation2 + $0x60] sm:$0xff] }
 0x7a3   :  { %v3633_v60 = vsel %vm2122_vm7, 1.0, %v3984_v5 }
 0x7a4   :  { %3886 = vmatmul.mubr.msk.f32.vlgmr.msra.gmra.mxu1 %vm2118_vm11, %v3633_v60 }
 0x7a5   :  { %2366 = vmatprep.mubr.f32.mxu1 %v3984_v5  ;;  %3640 = vmatpush1.msk.msra.mxu1 %vm2128_vm2, %v99_v61  ;;  %v305_v61 = vld [vmem:[#allocation2 + $0x258] sm:$0xff] }
 0x7a6   :  { %3645 = vmatprep.subr.msk.mxu1 %vm2128_vm2, %v2211_v56  ;;  %v302_v56 = vld [vmem:[#allocation2 + $0x240] sm:$0xff] }
 0x864   :  { %v2198_v18 = vpop.f32.mrf.mxu1 }
 0x865   :  { %vm2202_vm13 = vcmp.lt.f32.partialorder %v2198_v18, 0.5  ;;  %v237_v18 = vld [vmem:[#allocation2 + $0x38] sm:$0xff] }
 0x866   :  { %v2203_v19 = vsel %vm2202_vm13, %v3633_v60, 0.0  ;;  %v3887_v48 = vpop.f32.mrf.mxu1  ;;  %v306_v60 = vld [vmem:[#allocation2 + $0x260] sm:$0xff] }
 0x867   :  { %3638 = vmatmul.mubr.msk.f32.vlgmr.msra.gmra.mxu0 %vm2118_vm11, %v2203_v19  ;;  %3641 = vmatmul.mubr.msk.f32.vlgmr.msra.gmra.mxu1 %vm2118_vm11, %v2203_v19  ;;  %v236_v48 = vld [vmem:[#allocation2 + $0x30] sm:$0xff] }
 0x868   :  { %3643 = vmatpush1.msk.msra.mxu0 %vm2128_vm2, %v100_v10  ;;  %2437 = vmatprep.mubr.f32.mxu0 %v3984_v5  ;;  %v239_v10 = vld [vmem:[#allocation2 + $0x48] sm:$0xff] }
 0x869   :  { %3646 = vmatpush1.msk.msra.mxu1 %vm2128_vm2, %v101_v11  ;;  %2508 = vmatprep.mubr.f32.mxu1 %v3984_v5  ;;  %v303_v11 = vld [vmem:[#allocation2 + $0x248] sm:$0xff] }
 0x86a   :  { %2523 = vmatprep.subr.mxu0 %v261_v20  ;;  %2594 = vmatprep.subr.mxu1 %v325_v4  ;;  %v300_v20 = vld [vmem:[#allocation2 + $0x230] sm:$0xff]  ;;  %v235_v4 = vld [vmem:[#allocation2 + $0x28] sm:$0xff] }
 0x86b   :  { %3644 = vmatmul.mubr.msk.f32.vlgmr.msra.gmra.mxu0 %vm2118_vm11, %v2203_v19  ;;  %3647 = vmatmul.mubr.msk.f32.vlgmr.msra.gmra.mxu1 %vm2118_vm11, %v2203_v19  ;;  %v301_v19 = vld [vmem:[#allocation2 + $0x238] sm:$0xff] }
 0x86c   :  { %2524 = vmatpush1.msra.mxu0 %v260_v7  ;;  %2595 = vmatpush1.msra.mxu1 %v324_v44  ;;  %v299_v7 = vld [vmem:[#allocation2 + $0x228] sm:$0xff]  ;;  %v234_v44 = vld [vmem:[#allocation2 + $0x20] sm:$0xff] }
 0x86d   :  { %2525 = vmatprep.subr.mxu0 %v259_v47  ;;  %2596 = vmatprep.subr.mxu1 %v323_v16  ;;  %v298_v47 = vld [vmem:[#allocation2 + $0x220] sm:$0xff]  ;;  %v233_v16 = vld [vmem:[#allocation2 + $0x18] sm:$0xff] }
 0x86e   :  { %2526 = vmatpush1.msra.mxu0 %v258_v21  ;;  %2597 = vmatpush1.msra.mxu1 %v322_v53  ;;  %v297_v21 = vld [vmem:[#allocation2 + $0x218] sm:$0xff]  ;;  %v232_v53 = vld [vmem:[#allocation2 + $0x10] sm:$0xff] }
 0x86f   :  { %2527 = vmatprep.subr.mxu0 %v257_v24  ;;  %2598 = vmatprep.subr.mxu1 %v321_v25  ;;  %v296_v24 = vld [vmem:[#allocation2 + $0x210] sm:$0xff]  ;;  %v231_v25 = vld [vmem:[#allocation2 + $0x8] sm:$0xff] }
 0x870   :  { %2528 = vmatpush1.msra.mxu0 %v256_v59  ;;  %2599 = vmatpush1.msra.mxu1 %v320_v6  ;;  %v295_v59 = vld [vmem:[#allocation2 + $0x208] sm:$0xff]  ;;  %v230_v6 = vld [vmem:[#allocation2] sm:$0xff] }
 0x871   :  { %2529 = vmatprep.subr.mxu0 %v255_v26  ;;  %2600 = vmatprep.subr.mxu1 %v319_v8  ;;  %v294_v26 = vld [vmem:[#allocation2 + $0x200] sm:$0xff]  ;;  %v293_v8 = vld [vmem:[#allocation2 + $0x1f8] sm:$0xff] }
 0x872   :  { %2530 = vmatpush1.msra.mxu0 %v254_v32  ;;  %2601 = vmatpush1.msra.mxu1 %v318_v33  ;;  %v357_v32 = vld [vmem:[#allocation2 + $0x3f8] sm:$0xff]  ;;  %v292_v33 = vld [vmem:[#allocation2 + $0x1f0] sm:$0xff] }
 0x873   :  { %2531 = vmatprep.subr.mxu0 %v253_v34  ;;  %2602 = vmatprep.subr.mxu1 %v317_v36  ;;  %v356_v34 = vld [vmem:[#allocation2 + $0x3f0] sm:$0xff]  ;;  %v291_v36 = vld [vmem:[#allocation2 + $0x1e8] sm:$0xff] }
 0x874   :  { %2532 = vmatpush1.msra.mxu0 %v252_v37  ;;  %2603 = vmatpush1.msra.mxu1 %v316_v39  ;;  %v355_v37 = vld [vmem:[#allocation2 + $0x3e8] sm:$0xff]  ;;  %v290_v39 = vld [vmem:[#allocation2 + $0x1e0] sm:$0xff] }
 0x875   :  { %2533 = vmatprep.subr.mxu0 %v251_v40  ;;  %2604 = vmatprep.subr.mxu1 %v315_v41  ;;  %v354_v40 = vld [vmem:[#allocation2 + $0x3e0] sm:$0xff]  ;;  %v289_v41 = vld [vmem:[#allocation2 + $0x1d8] sm:$0xff] }
 0x876   :  { %2534 = vmatpush1.msra.mxu0 %v250_v42  ;;  %2605 = vmatpush1.msra.mxu1 %v314_v45  ;;  %v353_v42 = vld [vmem:[#allocation2 + $0x3d8] sm:$0xff]  ;;  %v288_v45 = vld [vmem:[#allocation2 + $0x1d0] sm:$0xff] }
 0x877   :  { %2535 = vmatprep.subr.mxu0 %v249_v49  ;;  %2606 = vmatprep.subr.mxu1 %v313_v50  ;;  %v352_v49 = vld [vmem:[#allocation2 + $0x3d0] sm:$0xff]  ;;  %v287_v50 = vld [vmem:[#allocation2 + $0x1c8] sm:$0xff] }
 0x878   :  { %2536 = vmatpush1.msra.mxu0 %v248_v12  ;;  %2607 = vmatpush1.msra.mxu1 %v312_v51  ;;  %v351_v12 = vld [vmem:[#allocation2 + $0x3c8] sm:$0xff]  ;;  %v286_v51 = vld [vmem:[#allocation2 + $0x1c0] sm:$0xff] }
 0x879   :  { %2537 = vmatprep.subr.mxu0 %v247_v22  ;;  %2608 = vmatprep.subr.mxu1 %v311_v62  ;;  %v350_v22 = vld [vmem:[#allocation2 + $0x3c0] sm:$0xff]  ;;  %v285_v62 = vld [vmem:[#allocation2 + $0x1b8] sm:$0xff] }
 0x87a   :  { %2538 = vmatpush1.msra.mxu0 %v246_v35  ;;  %2609 = vmatpush1.msra.mxu1 %v310_v63  ;;  %v349_v35 = vld [vmem:[#allocation2 + $0x3b8] sm:$0xff]  ;;  %v284_v63 = vld [vmem:[#allocation2 + $0x1b0] sm:$0xff] }
 0x87b   :  { %2539 = vmatprep.subr.mxu0 %v245_v54  ;;  %2610 = vmatprep.subr.mxu1 %v309_v55  ;;  %v348_v54 = vld [vmem:[#allocation2 + $0x3b0] sm:$0xff]  ;;  %v283_v55 = vld [vmem:[#allocation2 + $0x1a8] sm:$0xff] }
 0x87c   :  { %2540 = vmatpush1.msra.mxu0 %v244_v1  ;;  %2611 = vmatpush1.msra.mxu1 %v308_v57  ;;  %v347_v1 = vld [vmem:[#allocation2 + $0x3a8] sm:$0xff]  ;;  %v282_v57 = vld [vmem:[#allocation2 + $0x1a0] sm:$0xff] }
 0x87d   :  { %2541 = vmatprep.subr.mxu0 %v243_v23  ;;  %2612 = vmatprep.subr.mxu1 %v307_v2  ;;  %v346_v23 = vld [vmem:[#allocation2 + $0x3a0] sm:$0xff]  ;;  %v281_v2 = vld [vmem:[#allocation2 + $0x198] sm:$0xff] }
 0x87e   :  { %2542 = vmatpush1.msra.mxu0 %v242_v58  ;;  %2613 = vmatpush1.msra.mxu1 %v306_v60  ;;  %v345_v58 = vld [vmem:[#allocation2 + $0x398] sm:$0xff]  ;;  %v280_v60 = vld [vmem:[#allocation2 + $0x190] sm:$0xff] }
 0x87f   :  { %2543 = vmatprep.subr.mxu0 %v241_v14  ;;  %2614 = vmatprep.subr.mxu1 %v305_v61  ;;  %v344_v14 = vld [vmem:[#allocation2 + $0x390] sm:$0xff]  ;;  %v279_v61 = vld [vmem:[#allocation2 + $0x188] sm:$0xff] }
 0x880   :  { %2544 = vmatpush1.msra.mxu0 %v240_v46  ;;  %2615 = vmatpush1.msra.mxu1 %v304_v29  ;;  %v343_v46 = vld [vmem:[#allocation2 + $0x388] sm:$0xff]  ;;  %v278_v29 = vld [vmem:[#allocation2 + $0x180] sm:$0xff] }
 0x881   :  { %2545 = vmatprep.subr.mxu0 %v239_v10  ;;  %2616 = vmatprep.subr.mxu1 %v303_v11  ;;  %v342_v10 = vld [vmem:[#allocation2 + $0x380] sm:$0xff]  ;;  %v277_v11 = vld [vmem:[#allocation2 + $0x178] sm:$0xff] }
 0x882   :  { %2546 = vmatpush1.msra.mxu0 %v238_v52  ;;  %2617 = vmatpush1.msra.mxu1 %v302_v56  ;;  %v341_v52 = vld [vmem:[#allocation2 + $0x378] sm:$0xff]  ;;  %v276_v56 = vld [vmem:[#allocation2 + $0x170] sm:$0xff] }
 0x883   :  { %2547 = vmatprep.subr.mxu0 %v237_v18  ;;  %2618 = vmatprep.subr.mxu1 %v301_v19  ;;  %v340_v18 = vld [vmem:[#allocation2 + $0x370] sm:$0xff]  ;;  %v275_v19 = vld [vmem:[#allocation2 + $0x168] sm:$0xff] }
 0x884   :  { %2548 = vmatpush1.msra.mxu0 %v236_v48  ;;  %2619 = vmatpush1.msra.mxu1 %v300_v20  ;;  %v339_v48 = vld [vmem:[#allocation2 + $0x368] sm:$0xff]  ;;  %v274_v20 = vld [vmem:[#allocation2 + $0x160] sm:$0xff] }
 0x885   :  { %2549 = vmatprep.subr.mxu0 %v235_v4  ;;  %2620 = vmatprep.subr.mxu1 %v299_v7  ;;  %v338_v4 = vld [vmem:[#allocation2 + $0x360] sm:$0xff]  ;;  %v273_v7 = vld [vmem:[#allocation2 + $0x158] sm:$0xff] }
 0x886   :  { %2550 = vmatpush1.msra.mxu0 %v234_v44  ;;  %2621 = vmatpush1.msra.mxu1 %v298_v47  ;;  %v337_v44 = vld [vmem:[#allocation2 + $0x358] sm:$0xff]  ;;  %v272_v47 = vld [vmem:[#allocation2 + $0x150] sm:$0xff] }
 0x887   :  { %2551 = vmatprep.subr.mxu0 %v233_v16  ;;  %2622 = vmatprep.subr.mxu1 %v297_v21  ;;  %v336_v16 = vld [vmem:[#allocation2 + $0x350] sm:$0xff]  ;;  %v271_v21 = vld [vmem:[#allocation2 + $0x148] sm:$0xff] }
 0x888   :  { %2552 = vmatpush1.msra.mxu0 %v232_v53  ;;  %2623 = vmatpush1.msra.mxu1 %v296_v24  ;;  %v335_v53 = vld [vmem:[#allocation2 + $0x348] sm:$0xff]  ;;  %v270_v24 = vld [vmem:[#allocation2 + $0x140] sm:$0xff] }
 0x889   :  { %2553 = vmatprep.subr.mxu0 %v231_v25  ;;  %2624 = vmatprep.subr.mxu1 %v295_v59  ;;  %v334_v25 = vld [vmem:[#allocation2 + $0x340] sm:$0xff]  ;;  %v269_v59 = vld [vmem:[#allocation2 + $0x138] sm:$0xff] }
 0x88a   :  { %2554 = vmatpush1.msra.mxu0 %v230_v6  ;;  %2625 = vmatpush1.msra.mxu1 %v294_v26  ;;  %v333_v6 = vld [vmem:[#allocation2 + $0x338] sm:$0xff]  ;;  %v268_v26 = vld [vmem:[#allocation2 + $0x130] sm:$0xff] }
 0x88b   :  { %2555 = vmatprep.subr.mxu0 %v293_v8  ;;  %2626 = vmatprep.subr.mxu1 %v357_v32  ;;  %v332_v8 = vld [vmem:[#allocation2 + $0x330] sm:$0xff]  ;;  %v267_v32 = vld [vmem:[#allocation2 + $0x128] sm:$0xff] }
 0x88c   :  { %2556 = vmatpush2.msra.mxu0 %v292_v33  ;;  %2627 = vmatpush2.msra.mxu1 %v356_v34  ;;  %v331_v33 = vld [vmem:[#allocation2 + $0x328] sm:$0xff]  ;;  %v266_v34 = vld [vmem:[#allocation2 + $0x120] sm:$0xff] }
 0x88d   :  { %2557 = vmatprep.subr.mxu0 %v291_v36  ;;  %2628 = vmatprep.subr.mxu1 %v355_v37  ;;  %v330_v36 = vld [vmem:[#allocation2 + $0x320] sm:$0xff]  ;;  %v265_v37 = vld [vmem:[#allocation2 + $0x118] sm:$0xff] }
 0x88e   :  { %2558 = vmatpush2.msra.mxu0 %v290_v39  ;;  %2629 = vmatpush2.msra.mxu1 %v354_v40  ;;  %v329_v39 = vld [vmem:[#allocation2 + $0x318] sm:$0xff]  ;;  %v264_v40 = vld [vmem:[#allocation2 + $0x110] sm:$0xff] }
 0x88f   :  { %2559 = vmatprep.subr.mxu0 %v289_v41  ;;  %2630 = vmatprep.subr.mxu1 %v353_v42  ;;  %v328_v41 = vld [vmem:[#allocation2 + $0x310] sm:$0xff]  ;;  %v263_v42 = vld [vmem:[#allocation2 + $0x108] sm:$0xff] }
 0x890   :  { %2560 = vmatpush2.msra.mxu0 %v288_v45  ;;  %2631 = vmatpush2.msra.mxu1 %v352_v49  ;;  %v327_v45 = vld [vmem:[#allocation2 + $0x308] sm:$0xff]  ;;  %v262_v49 = vld [vmem:[#allocation2 + $0x100] sm:$0xff] }
 0x891   :  { %2561 = vmatprep.subr.mxu0 %v287_v50  ;;  %2632 = vmatprep.subr.mxu1 %v351_v12  ;;  %v326_v50 = vld [vmem:[#allocation2 + $0x300] sm:$0xff]  ;;  %v389_v12 = vld [vmem:[#allocation2 + $0x4f8] sm:$0xff] }
 0x892   :  { %2562 = vmatpush2.msra.mxu0 %v286_v51  ;;  %2633 = vmatpush2.msra.mxu1 %v350_v22  ;;  %v453_v51 = vld [vmem:[#allocation2 + $0x6f8] sm:$0xff] }
 0x893   :  { %2563 = vmatprep.subr.mxu0 %v285_v62  ;;  %2634 = vmatprep.subr.mxu1 %v349_v35 }
 0x894   :  { %2564 = vmatpush2.msra.mxu0 %v284_v63  ;;  %2635 = vmatpush2.msra.mxu1 %v348_v54 }
 0x895   :  { %2565 = vmatprep.subr.mxu0 %v283_v55  ;;  %2636 = vmatprep.subr.mxu1 %v347_v1 }
 0x896   :  { %2566 = vmatpush2.msra.mxu0 %v282_v57  ;;  %2637 = vmatpush2.msra.mxu1 %v346_v23 }
 0x897   :  { %2567 = vmatprep.subr.mxu0 %v281_v2  ;;  %2638 = vmatprep.subr.mxu1 %v345_v58  ;;  %v388_v58 = vld [vmem:[#allocation2 + $0x4f0] sm:$0xff] }
 0x898   :  { %2568 = vmatpush2.msra.mxu0 %v280_v60  ;;  %2639 = vmatpush2.msra.mxu1 %v344_v14  ;;  %v452_v60 = vld [vmem:[#allocation2 + $0x6f0] sm:$0xff]  ;;  %v387_v14 = vld [vmem:[#allocation2 + $0x4e8] sm:$0xff] }
 0x899   :  { %2569 = vmatprep.subr.mxu0 %v279_v61  ;;  %2640 = vmatprep.subr.mxu1 %v343_v46  ;;  %v451_v61 = vld [vmem:[#allocation2 + $0x6e8] sm:$0xff] }
 0x89a   :  { %2570 = vmatpush2.msra.mxu0 %v278_v29  ;;  %2641 = vmatpush2.msra.mxu1 %v342_v10  ;;  %v385_v10 = vld [vmem:[#allocation2 + $0x4d8] sm:$0xff] }
 0x89b   :  { %2571 = vmatprep.subr.mxu0 %v277_v11  ;;  %2642 = vmatprep.subr.mxu1 %v341_v52  ;;  %v449_v11 = vld [vmem:[#allocation2 + $0x6d8] sm:$0xff]  ;;  %v384_v52 = vld [vmem:[#allocation2 + $0x4d0] sm:$0xff] }
 0x89c   :  { %2572 = vmatpush2.msra.mxu0 %v276_v56  ;;  %2643 = vmatpush2.msra.mxu1 %v340_v18  ;;  %v448_v56 = vld [vmem:[#allocation2 + $0x6d0] sm:$0xff]  ;;  %v383_v18 = vld [vmem:[#allocation2 + $0x4c8] sm:$0xff] }
 0x89d   :  { %2573 = vmatprep.subr.mxu0 %v275_v19  ;;  %2644 = vmatprep.subr.mxu1 %v339_v48  ;;  %v447_v19 = vld [vmem:[#allocation2 + $0x6c8] sm:$0xff]  ;;  %v382_v48 = vld [vmem:[#allocation2 + $0x4c0] sm:$0xff] }
 0x89e   :  { %2574 = vmatpush2.msra.mxu0 %v274_v20  ;;  %2645 = vmatpush2.msra.mxu1 %v338_v4  ;;  %v445_v20 = vld [vmem:[#allocation2 + $0x6b8] sm:$0xff]  ;;  %v380_v4 = vld [vmem:[#allocation2 + $0x4b0] sm:$0xff] }
 0x89f   :  { %2575 = vmatprep.subr.mxu0 %v273_v7  ;;  %2646 = vmatprep.subr.mxu1 %v337_v44  ;;  %v444_v7 = vld [vmem:[#allocation2 + $0x6b0] sm:$0xff]  ;;  %v379_v44 = vld [vmem:[#allocation2 + $0x4a8] sm:$0xff] }
 0x8a0   :  { %2576 = vmatpush2.msra.mxu0 %v272_v47  ;;  %2647 = vmatpush2.msra.mxu1 %v336_v16  ;;  %v443_v47 = vld [vmem:[#allocation2 + $0x6a8] sm:$0xff]  ;;  %v378_v16 = vld [vmem:[#allocation2 + $0x4a0] sm:$0xff] }
 0x8a1   :  { %2577 = vmatprep.subr.mxu0 %v271_v21  ;;  %2648 = vmatprep.subr.mxu1 %v335_v53  ;;  %v442_v21 = vld [vmem:[#allocation2 + $0x6a0] sm:$0xff]  ;;  %v377_v53 = vld [vmem:[#allocation2 + $0x498] sm:$0xff] }
 0x8a2   :  { %2578 = vmatpush2.msra.mxu0 %v270_v24  ;;  %2649 = vmatpush2.msra.mxu1 %v334_v25  ;;  %v441_v24 = vld [vmem:[#allocation2 + $0x698] sm:$0xff]  ;;  %v376_v25 = vld [vmem:[#allocation2 + $0x490] sm:$0xff] }
 0x8a3   :  { %2579 = vmatprep.subr.mxu0 %v269_v59  ;;  %2650 = vmatprep.subr.mxu1 %v333_v6  ;;  %v440_v59 = vld [vmem:[#allocation2 + $0x690] sm:$0xff]  ;;  %v375_v6 = vld [vmem:[#allocation2 + $0x488] sm:$0xff] }
 0x8a4   :  { %2580 = vmatpush2.msra.mxu0 %v268_v26  ;;  %2651 = vmatpush2.msra.mxu1 %v332_v8  ;;  %v439_v26 = vld [vmem:[#allocation2 + $0x688] sm:$0xff]  ;;  %v374_v8 = vld [vmem:[#allocation2 + $0x480] sm:$0xff] }
 0x8a5   :  { %2581 = vmatprep.subr.mxu0 %v267_v32  ;;  %2652 = vmatprep.subr.mxu1 %v331_v33  ;;  %v438_v32 = vld [vmem:[#allocation2 + $0x680] sm:$0xff]  ;;  %v373_v33 = vld [vmem:[#allocation2 + $0x478] sm:$0xff] }
 0x8a6   :  { %2582 = vmatpush2.msra.mxu0 %v266_v34  ;;  %2653 = vmatpush2.msra.mxu1 %v330_v36  ;;  %v437_v34 = vld [vmem:[#allocation2 + $0x678] sm:$0xff]  ;;  %v372_v36 = vld [vmem:[#allocation2 + $0x470] sm:$0xff] }
 0x8a7   :  { %2583 = vmatprep.subr.mxu0 %v265_v37  ;;  %2654 = vmatprep.subr.mxu1 %v329_v39  ;;  %v436_v37 = vld [vmem:[#allocation2 + $0x670] sm:$0xff]  ;;  %v371_v39 = vld [vmem:[#allocation2 + $0x468] sm:$0xff] }
 0x8a8   :  { %2584 = vmatpush2.msra.mxu0 %v264_v40  ;;  %2655 = vmatpush2.msra.mxu1 %v328_v41  ;;  %v435_v40 = vld [vmem:[#allocation2 + $0x668] sm:$0xff]  ;;  %v370_v41 = vld [vmem:[#allocation2 + $0x460] sm:$0xff] }
 0x8a9   :  { %2585 = vmatprep.subr.mxu0 %v263_v42  ;;  %2656 = vmatprep.subr.mxu1 %v327_v45  ;;  %v434_v42 = vld [vmem:[#allocation2 + $0x660] sm:$0xff]  ;;  %v369_v45 = vld [vmem:[#allocation2 + $0x458] sm:$0xff] }
 0x8aa   :  { %2586 = vmatpush2.msra.mxu0 %v262_v49  ;;  %2657 = vmatpush2.msra.mxu1 %v326_v50  ;;  %v433_v49 = vld [vmem:[#allocation2 + $0x658] sm:$0xff]  ;;  %v368_v50 = vld [vmem:[#allocation2 + $0x450] sm:$0xff] }
 0x8ab   :  { %2665 = vmatprep.subr.mxu0 %v389_v12  ;;  %2736 = vmatprep.subr.mxu1 %v453_v51  ;;  %v432_v12 = vld [vmem:[#allocation2 + $0x650] sm:$0xff]  ;;  %v367_v51 = vld [vmem:[#allocation2 + $0x448] sm:$0xff] }
 0x927   :  { %v2297_v22 = vpop.f32.mrf.mxu0  ;;  %v2368_v62 = vpop.f32.mrf.mxu1 }
 0x928   :  { %v2515_v1 = vmul.f32 %v2297_v22, %v4784_v27  ;;  %v2517_v57 = vmul.f32 %v2368_v62, %v4786_v28  ;;  %v431_v22 = vld [vmem:[#allocation2 + $0x648] sm:$0xff]  ;;  %v366_v62 = vld [vmem:[#allocation2 + $0x440] sm:$0xff] }
 0x929   :  { %v2299_v35 = vpop.f32.mrf.mxu0  ;;  %v2370_v63 = vpop.f32.mrf.mxu1 }
 0x92a   :  { %v2516_v54 = vmul.f32 %v2299_v35, %v4776_v3  ;;  %v2518_v55 = vmul.f32 %v2370_v63, %v4778_v38  ;;  %v386_v3 = vld [vmem:[#allocation2 + $0x4e0] sm:$0xff]  ;;  %v365_v63 = vld [vmem:[#allocation2 + $0x438] sm:$0xff] }
 0x92b   :  { %v5049_v23 = vpop.f32.mrf.mxu0  ;;  %v5051_v2 = vpop.f32.mrf.mxu1  ;;  %v450_v38 = vld [vmem:[#allocation2 + $0x6e0] sm:$0xff] }
 0x92c   :  { %2587 = vmatprep.mubr.f32.mxu0 %v2516_v54  ;;  %2658 = vmatprep.mubr.f32.mxu1 %v2518_v55  ;;  %v430_v35 = vld [vmem:[#allocation2 + $0x640] sm:$0xff]  ;;  %v429_v54 = vld [vmem:[#allocation2 + $0x638] sm:$0xff]  ;;  %v364_v55 = vld [vmem:[#allocation2 + $0x430] sm:$0xff] }
 0x92d   :  { %v2441_v46 = vpop.f32.mrf.mxu0  ;;  %v2512_v29 = vpop.f32.mrf.mxu1  ;;  %2588 = vmatmul.mubr.f32.vlgmr.msra.gmra.mxu0 %v2515_v1  ;;  %2659 = vmatmul.mubr.f32.vlgmr.msra.gmra.mxu1 %v2517_v57  ;;  %v428_v1 = vld [vmem:[#allocation2 + $0x630] sm:$0xff]  ;;  %v363_v57 = vld [vmem:[#allocation2 + $0x428] sm:$0xff] }
 0x92e   :  { %v2520_v27 = vmul.f32 %v2441_v46, %v4798_v43  ;;  %v2522_v28 = vmul.f32 %v2512_v29, %v4811_v9  ;;  %2666 = vmatpush1.msra.mxu0 %v388_v58  ;;  %2737 = vmatpush1.msra.mxu1 %v452_v60  ;;  %v446_v43 = vld [vmem:[#allocation2 + $0x6c0] sm:$0xff]  ;;  %v381_v9 = vld [vmem:[#allocation2 + $0x4b8] sm:$0xff]  ;;  %v427_v58 = vld [vmem:[#allocation2 + $0x628] sm:$0xff] }
 0x92f   :  { %2667 = vmatprep.subr.mxu0 %v387_v14  ;;  %2738 = vmatprep.subr.mxu1 %v451_v61  ;;  %v362_v60 = vld [vmem:[#allocation2 + $0x420] sm:$0xff]  ;;  %v361_v61 = vld [vmem:[#allocation2 + $0x418] sm:$0xff]  ;;  %v360_v29 = vld [vmem:[#allocation2 + $0x410] sm:$0xff] }
 0x930   :  { %2668 = vmatpush1.msra.mxu0 %v386_v3  ;;  %2739 = vmatpush1.msra.mxu1 %v450_v38  ;;  %v426_v14 = vld [vmem:[#allocation2 + $0x620] sm:$0xff]  ;;  %v425_v46 = vld [vmem:[#allocation2 + $0x618] sm:$0xff]  ;;  %v424_v3 = vld [vmem:[#allocation2 + $0x610] sm:$0xff] }
 0x931   :  { %2669 = vmatprep.subr.mxu0 %v385_v10  ;;  %2729 = vmatprep.mubr.f32.mxu0 %v2520_v27  ;;  %v359_v38 = vld [vmem:[#allocation2 + $0x408] sm:$0xff]  ;;  %v422_v10 = vld [vmem:[#allocation2 + $0x600] sm:$0xff] }
 0x932   :  { %2740 = vmatprep.subr.mxu1 %v449_v11  ;;  %2800 = vmatprep.mubr.f32.mxu1 %v2522_v28  ;;  %v423_v27 = vld [vmem:[#allocation2 + $0x608] sm:$0xff]  ;;  %v358_v28 = vld [vmem:[#allocation2 + $0x400] sm:$0xff]  ;;  %v421_v11 = vld [vmem:[#allocation2 + $0x5f8] sm:$0xff] }
 0x933   :  { %2670 = vmatpush1.msra.mxu0 %v384_v52  ;;  %2741 = vmatpush1.msra.mxu1 %v448_v56  ;;  %v485_v52 = vld [vmem:[#allocation2 + $0x7f8] sm:$0xff]  ;;  %v420_v56 = vld [vmem:[#allocation2 + $0x5f0] sm:$0xff] }
 0x934   :  { %2671 = vmatprep.subr.mxu0 %v383_v18  ;;  %2742 = vmatprep.subr.mxu1 %v447_v19  ;;  %v484_v18 = vld [vmem:[#allocation2 + $0x7f0] sm:$0xff]  ;;  %v419_v19 = vld [vmem:[#allocation2 + $0x5e8] sm:$0xff] }
 0x935   :  { %2672 = vmatpush1.msra.mxu0 %v382_v48  ;;  %2743 = vmatpush1.msra.mxu1 %v446_v43  ;;  %v483_v48 = vld [vmem:[#allocation2 + $0x7e8] sm:$0xff]  ;;  %v418_v43 = vld [vmem:[#allocation2 + $0x5e0] sm:$0xff] }
 0x936   :  { %2673 = vmatprep.subr.mxu0 %v381_v9  ;;  %2744 = vmatprep.subr.mxu1 %v445_v20  ;;  %v482_v9 = vld [vmem:[#allocation2 + $0x7e0] sm:$0xff]  ;;  %v417_v20 = vld [vmem:[#allocation2 + $0x5d8] sm:$0xff] }
 0x937   :  { %2674 = vmatpush1.msra.mxu0 %v380_v4  ;;  %2745 = vmatpush1.msra.mxu1 %v444_v7  ;;  %v481_v4 = vld [vmem:[#allocation2 + $0x7d8] sm:$0xff]  ;;  %v416_v7 = vld [vmem:[#allocation2 + $0x5d0] sm:$0xff] }
 0x938   :  { %2675 = vmatprep.subr.mxu0 %v379_v44  ;;  %2746 = vmatprep.subr.mxu1 %v443_v47  ;;  %v480_v44 = vld [vmem:[#allocation2 + $0x7d0] sm:$0xff]  ;;  %v415_v47 = vld [vmem:[#allocation2 + $0x5c8] sm:$0xff] }
 0x939   :  { %2676 = vmatpush1.msra.mxu0 %v378_v16  ;;  %2747 = vmatpush1.msra.mxu1 %v442_v21  ;;  %v479_v16 = vld [vmem:[#allocation2 + $0x7c8] sm:$0xff]  ;;  %v414_v21 = vld [vmem:[#allocation2 + $0x5c0] sm:$0xff] }
 0x93a   :  { %2677 = vmatprep.subr.mxu0 %v377_v53  ;;  %2748 = vmatprep.subr.mxu1 %v441_v24  ;;  %v478_v53 = vld [vmem:[#allocation2 + $0x7c0] sm:$0xff]  ;;  %v413_v24 = vld [vmem:[#allocation2 + $0x5b8] sm:$0xff] }
 0x93b   :  { %2678 = vmatpush1.msra.mxu0 %v376_v25  ;;  %2749 = vmatpush1.msra.mxu1 %v440_v59  ;;  %v477_v25 = vld [vmem:[#allocation2 + $0x7b8] sm:$0xff]  ;;  %v412_v59 = vld [vmem:[#allocation2 + $0x5b0] sm:$0xff] }
 0x93c   :  { %2679 = vmatprep.subr.mxu0 %v375_v6  ;;  %2750 = vmatprep.subr.mxu1 %v439_v26  ;;  %v476_v6 = vld [vmem:[#allocation2 + $0x7b0] sm:$0xff]  ;;  %v411_v26 = vld [vmem:[#allocation2 + $0x5a8] sm:$0xff] }
 0x93d   :  { %2680 = vmatpush1.msra.mxu0 %v374_v8  ;;  %2751 = vmatpush1.msra.mxu1 %v438_v32  ;;  %v475_v8 = vld [vmem:[#allocation2 + $0x7a8] sm:$0xff]  ;;  %v410_v32 = vld [vmem:[#allocation2 + $0x5a0] sm:$0xff] }
 0x93e   :  { %2681 = vmatprep.subr.mxu0 %v373_v33  ;;  %2752 = vmatprep.subr.mxu1 %v437_v34  ;;  %v474_v33 = vld [vmem:[#allocation2 + $0x7a0] sm:$0xff]  ;;  %v409_v34 = vld [vmem:[#allocation2 + $0x598] sm:$0xff] }
 0x93f   :  { %2682 = vmatpush1.msra.mxu0 %v372_v36  ;;  %2753 = vmatpush1.msra.mxu1 %v436_v37  ;;  %v473_v36 = vld [vmem:[#allocation2 + $0x798] sm:$0xff]  ;;  %v408_v37 = vld [vmem:[#allocation2 + $0x590] sm:$0xff] }
 0x940   :  { %2683 = vmatprep.subr.mxu0 %v371_v39  ;;  %2754 = vmatprep.subr.mxu1 %v435_v40  ;;  %v472_v39 = vld [vmem:[#allocation2 + $0x790] sm:$0xff]  ;;  %v407_v40 = vld [vmem:[#allocation2 + $0x588] sm:$0xff] }
 0x941   :  { %2684 = vmatpush1.msra.mxu0 %v370_v41  ;;  %2755 = vmatpush1.msra.mxu1 %v434_v42  ;;  %v471_v41 = vld [vmem:[#allocation2 + $0x788] sm:$0xff]  ;;  %v406_v42 = vld [vmem:[#allocation2 + $0x580] sm:$0xff] }
 0x942   :  { %2685 = vmatprep.subr.mxu0 %v369_v45  ;;  %2756 = vmatprep.subr.mxu1 %v433_v49  ;;  %v470_v45 = vld [vmem:[#allocation2 + $0x780] sm:$0xff]  ;;  %v405_v49 = vld [vmem:[#allocation2 + $0x578] sm:$0xff] }
 0x943   :  { %2686 = vmatpush1.msra.mxu0 %v368_v50  ;;  %2757 = vmatpush1.msra.mxu1 %v432_v12  ;;  %v469_v50 = vld [vmem:[#allocation2 + $0x778] sm:$0xff]  ;;  %v404_v12 = vld [vmem:[#allocation2 + $0x570] sm:$0xff] }
 0x944   :  { %2687 = vmatprep.subr.mxu0 %v367_v51  ;;  %2758 = vmatprep.subr.mxu1 %v431_v22  ;;  %v468_v51 = vld [vmem:[#allocation2 + $0x770] sm:$0xff]  ;;  %v403_v22 = vld [vmem:[#allocation2 + $0x568] sm:$0xff] }
 0x945   :  { %2688 = vmatpush1.msra.mxu0 %v366_v62  ;;  %2759 = vmatpush1.msra.mxu1 %v430_v35  ;;  %v467_v62 = vld [vmem:[#allocation2 + $0x768] sm:$0xff]  ;;  %v402_v35 = vld [vmem:[#allocation2 + $0x560] sm:$0xff] }
 0x946   :  { %2689 = vmatprep.subr.mxu0 %v365_v63  ;;  %2760 = vmatprep.subr.mxu1 %v429_v54  ;;  %v466_v63 = vld [vmem:[#allocation2 + $0x760] sm:$0xff]  ;;  %v401_v54 = vld [vmem:[#allocation2 + $0x558] sm:$0xff] }
 0x947   :  { %2690 = vmatpush1.msra.mxu0 %v364_v55  ;;  %2761 = vmatpush1.msra.mxu1 %v428_v1  ;;  %v465_v55 = vld [vmem:[#allocation2 + $0x758] sm:$0xff]  ;;  %v400_v1 = vld [vmem:[#allocation2 + $0x550] sm:$0xff] }
 0x948   :  { %2691 = vmatprep.subr.mxu0 %v363_v57  ;;  %2762 = vmatprep.subr.mxu1 %v427_v58  ;;  %v464_v57 = vld [vmem:[#allocation2 + $0x750] sm:$0xff]  ;;  %v399_v58 = vld [vmem:[#allocation2 + $0x548] sm:$0xff] }
 0x949   :  { %2692 = vmatpush1.msra.mxu0 %v362_v60  ;;  %2763 = vmatpush1.msra.mxu1 %v426_v14  ;;  %v463_v60 = vld [vmem:[#allocation2 + $0x748] sm:$0xff]  ;;  %v398_v14 = vld [vmem:[#allocation2 + $0x540] sm:$0xff] }
 0x94a   :  { %2693 = vmatprep.subr.mxu0 %v361_v61  ;;  %2764 = vmatprep.subr.mxu1 %v425_v46  ;;  %v462_v61 = vld [vmem:[#allocation2 + $0x740] sm:$0xff]  ;;  %v397_v46 = vld [vmem:[#allocation2 + $0x538] sm:$0xff] }
 0x94b   :  { %2694 = vmatpush1.msra.mxu0 %v360_v29  ;;  %2765 = vmatpush1.msra.mxu1 %v424_v3  ;;  %v461_v29 = vld [vmem:[#allocation2 + $0x738] sm:$0xff]  ;;  %v396_v3 = vld [vmem:[#allocation2 + $0x530] sm:$0xff] }
 0x94c   :  { %2695 = vmatprep.subr.mxu0 %v359_v38  ;;  %2766 = vmatprep.subr.mxu1 %v423_v27  ;;  %v460_v38 = vld [vmem:[#allocation2 + $0x730] sm:$0xff]  ;;  %v395_v27 = vld [vmem:[#allocation2 + $0x528] sm:$0xff] }
 0x94d   :  { %2696 = vmatpush1.msra.mxu0 %v358_v28  ;;  %2767 = vmatpush1.msra.mxu1 %v422_v10  ;;  %v459_v28 = vld [vmem:[#allocation2 + $0x728] sm:$0xff]  ;;  %v394_v10 = vld [vmem:[#allocation2 + $0x520] sm:$0xff] }
 0x94e   :  { %2697 = vmatprep.subr.mxu0 %v421_v11  ;;  %2768 = vmatprep.subr.mxu1 %v485_v52  ;;  %v458_v11 = vld [vmem:[#allocation2 + $0x720] sm:$0xff]  ;;  %v393_v52 = vld [vmem:[#allocation2 + $0x518] sm:$0xff] }
 0x94f   :  { %2698 = vmatpush2.msra.mxu0 %v420_v56  ;;  %2769 = vmatpush2.msra.mxu1 %v484_v18  ;;  %v457_v56 = vld [vmem:[#allocation2 + $0x718] sm:$0xff]  ;;  %v392_v18 = vld [vmem:[#allocation2 + $0x510] sm:$0xff] }
 0x950   :  { %2699 = vmatprep.subr.mxu0 %v419_v19  ;;  %2770 = vmatprep.subr.mxu1 %v483_v48  ;;  %v456_v19 = vld [vmem:[#allocation2 + $0x710] sm:$0xff]  ;;  %v391_v48 = vld [vmem:[#allocation2 + $0x508] sm:$0xff] }
 0x951   :  { %2700 = vmatpush2.msra.mxu0 %v418_v43  ;;  %2771 = vmatpush2.msra.mxu1 %v482_v9  ;;  %v455_v43 = vld [vmem:[#allocation2 + $0x708] sm:$0xff]  ;;  %v390_v9 = vld [vmem:[#allocation2 + $0x500] sm:$0xff] }
 0x952   :  { %2701 = vmatprep.subr.mxu0 %v417_v20  ;;  %2772 = vmatprep.subr.mxu1 %v481_v4  ;;  %v454_v20 = vld [vmem:[#allocation2 + $0x700] sm:$0xff]  ;;  %v2519_v4 = vmul.f32 %v5049_v23, %v4986_v30 }
 0x953   :  { %2702 = vmatpush2.msra.mxu0 %v416_v7  ;;  %2773 = vmatpush2.msra.mxu1 %v480_v44  ;;  %v2521_v7 = vmul.f32 %v5051_v2, %v4988_v31 }
 0x954   :  { %2703 = vmatprep.subr.mxu0 %v415_v47  ;;  %2774 = vmatprep.subr.mxu1 %v479_v16 }
 0x955   :  { %2704 = vmatpush2.msra.mxu0 %v414_v21  ;;  %2775 = vmatpush2.msra.mxu1 %v478_v53 }
 0x956   :  { %2705 = vmatprep.subr.mxu0 %v413_v24  ;;  %2776 = vmatprep.subr.mxu1 %v477_v25 }
 0x957   :  { %2706 = vmatpush2.msra.mxu0 %v412_v59  ;;  %2777 = vmatpush2.msra.mxu1 %v476_v6 }
 0x958   :  { %2707 = vmatprep.subr.mxu0 %v411_v26  ;;  %2778 = vmatprep.subr.mxu1 %v475_v8 }
 0x959   :  { %2708 = vmatpush2.msra.mxu0 %v410_v32  ;;  %2779 = vmatpush2.msra.mxu1 %v474_v33  ;;  %v2812_v32 = vld [vmem:[%s5371_s15] sm:$0x3] }
 0x95a   :  { %2709 = vmatprep.subr.mxu0 %v409_v34  ;;  %2780 = vmatprep.subr.mxu1 %v473_v36  ;;  %vm2919_vm14 = vcmp.gt.f32.partialorder %v2812_v32, 0.0  ;;  %v2830_v32 = vld [vmem:[%s5374_s18 + $0x78] sm:$0xff] }
 0x95b   :  { %2710 = vmatpush2.msra.mxu0 %v408_v37  ;;  %2781 = vmatpush2.msra.mxu1 %v472_v39  ;;  %v2920_v36 = vsel %vm2919_vm14, 1, %v3981_v0  ;;  %v2813_v37 = vld [vmem:[%s5372_s16] sm:$0x3] }
 0x95c   :  { %2711 = vmatprep.subr.mxu0 %v407_v40  ;;  %2782 = vmatprep.subr.mxu1 %v471_v41  ;;  %v2928_v39 = vrot.slane %v2920_v36, %v4209_v13  ;;  %v2924_v40 = vrot.slane %v2920_v36, %v4219_v17  ;;  %vm2892_vm15 = vcmp.gt.f32.partialorder %v2813_v37, 0.0  ;;  %v2844_v36 = vld [vmem:[%s5374_s18 + $0xe8] sm:$0xff] }
 0x95d   :  { %2712 = vmatpush2.msra.mxu0 %v406_v42  ;;  %2783 = vmatpush2.msra.mxu1 %v470_v45  ;;  %v2893_v45 = vsel %vm2892_vm15, 1, %v3981_v0  ;;  %v2828_v37 = vld [vmem:[%s5374_s18 + $0x68] sm:$0xff] }
 0x95e   :  { %2713 = vmatprep.subr.mxu0 %v405_v49  ;;  %2784 = vmatprep.subr.mxu1 %v469_v50  ;;  %vm2930_vm3 = vcmp.eq.s32.totalorder %v2928_v39, 1  ;;  %vm2929_vm4 = vcmp.eq.s32.totalorder %v2924_v40, 1  ;;  %v2843_v39 = vld [vmem:[%s5374_s18 + $0xe0] sm:$0xff] }
 0x95f   :  { %2714 = vmatpush2.msra.mxu0 %v404_v12  ;;  %2785 = vmatpush2.msra.mxu1 %v468_v51  ;;  %v2827_v40 = vld [vmem:[%s5374_s18 + $0x60] sm:$0xff] }
 0x960   :  { %2715 = vmatprep.subr.mxu0 %v403_v22  ;;  %2786 = vmatprep.subr.mxu1 %v467_v62 }
 0x961   :  { %2716 = vmatpush2.msra.mxu0 %v402_v35  ;;  %2787 = vmatpush2.msra.mxu1 %v466_v63  ;;  %v2901_v35 = vrot.slane %v2893_v45, %v4209_v13  ;;  %v2897_v63 = vrot.slane %v2893_v45, %v4219_v17  ;;  %v2841_v45 = vld [vmem:[%s5374_s18 + $0xd0] sm:$0xff] }
 0x962   :  { %2717 = vmatprep.subr.mxu0 %v401_v54  ;;  %2788 = vmatprep.subr.mxu1 %v465_v55 }
 0x963   :  { %2718 = vmatpush2.msra.mxu0 %v400_v1  ;;  %2789 = vmatpush2.msra.mxu1 %v464_v57  ;;  %vm2903_vm8 = vcmp.eq.s32.totalorder %v2901_v35, 1  ;;  %vm2902_vm7 = vcmp.eq.s32.totalorder %v2897_v63, 1  ;;  %v2822_v35 = vld [vmem:[%s5374_s18 + $0x38] sm:$0xff]  ;;  %v2837_v63 = vld [vmem:[%s5374_s18 + $0xb0] sm:$0xff] }
 0x964   :  { %2719 = vmatprep.subr.mxu0 %v399_v58  ;;  %2790 = vmatprep.subr.mxu1 %v463_v60 }
 0x965   :  { %2720 = vmatpush2.msra.mxu0 %v398_v14  ;;  %2791 = vmatpush2.msra.mxu1 %v462_v61  ;;  %v2807_v14 = vld [vmem:[%s5368_s12] sm:$0xff]  ;;  %v2808_v61 = vld [vmem:[%s5368_s12 + $0x8] sm:$0xff] }
 0x966   :  { %2721 = vmatprep.subr.mxu0 %v397_v46  ;;  %2792 = vmatprep.subr.mxu1 %v461_v29  ;;  %v2809_v46 = vld [vmem:[%s5368_s12 + $0x10] sm:$0xff] }
 0x967   :  { %2722 = vmatpush2.msra.mxu0 %v396_v3  ;;  %2793 = vmatpush2.msra.mxu1 %v460_v38 }
 0x968   :  { %2723 = vmatprep.subr.mxu0 %v395_v27  ;;  %2794 = vmatprep.subr.mxu1 %v459_v28 }
 0x969   :  { %2724 = vmatpush2.msra.mxu0 %v394_v10  ;;  %2795 = vmatpush2.msra.mxu1 %v458_v11 }
 0x96a   :  { %2725 = vmatprep.subr.mxu0 %v393_v52  ;;  %2796 = vmatprep.subr.mxu1 %v457_v56 }
 0x96b   :  { %2726 = vmatpush2.msra.mxu0 %v392_v18  ;;  %2797 = vmatpush2.msra.mxu1 %v456_v19 }
 0x96c   :  { %2727 = vmatprep.subr.mxu0 %v391_v48  ;;  %2798 = vmatprep.subr.mxu1 %v455_v43 }
 0x96d   :  { %2728 = vmatpush2.msra.mxu0 %v390_v9  ;;  %2799 = vmatpush2.msra.mxu1 %v454_v20 }
 0x96e   :  { %2730 = vmatmul.mubr.f32.vlgmr.msra.gmra.mxu0 %v2519_v4  ;;  %2801 = vmatmul.mubr.f32.vlgmr.msra.gmra.mxu1 %v2521_v7 }
 0x96f   :  { %3006 = vmatprep.mubr.f32.mxu0 %v3984_v5  ;;  %3107 = vmatprep.mubr.f32.mxu1 %v3984_v5 }
 0x9ed   :  { %v2589_v44 = vpop.f32.mrf.mxu0  ;;  %v2660_v47 = vpop.f32.mrf.mxu1 }
 0x9ee   :  { %v2661_v21 = vadd.f32 %v2660_v47, %v2589_v44  ;;  %v3931_v47 = vld [vmem:[%s5389_s28] sm:$0xff] }
 0x9ef   :  { %v2591_v16 = vpop.f32.mrf.mxu0  ;;  %v2662_v53 = vpop.f32.mrf.mxu1 }
 0x9f0   :  { %v2663_v2 = vadd.f32 %v2662_v53, %v2591_v16 }
 0xa2e   :  { %v2731_v24 = vpop.f32.mrf.mxu0  ;;  %v2802_v23 = vpop.f32.mrf.mxu1 }
 0xa2f   :  { %v2732_v30 = vadd.f32 %v2731_v24, %v2661_v21 }
 0xa30   :  { %v2733_v31 = vpop.f32.mrf.mxu0  ;;  %v2804_v6 = vpop.f32.mrf.mxu1 }
 0xa31   :  { %v2803_v25 = vadd.f32 %v2802_v23, %v2732_v30  ;;  %v2734_v59 = vadd.f32 %v2733_v31, %v2663_v2 }
 0xa33   :  { %2879 = vrot.lane.b32.xlu1 %v2803_v25, %s3985_s23  ;;  %2906 = vrot.lane.b32.xlu0 %v2803_v25, %s3982_s30  ;;  %v2805_v26 = vadd.f32 %v2804_v6, %v2734_v59 }
 0xa37   :  { %2912 = vrot.lane.b32.xlu0 %v2803_v25, %s3990_s9 }
 0xa3b   :  { %2885 = vrot.lane.b32.xlu0 %v2803_v25, %s3991_s3 }
 0xa3f   :  { %2908 = vrot.lane.b32.xlu0 %v2805_v26, %s3982_s30 }
 0xa43   :  { %2914 = vrot.lane.b32.xlu0 %v2805_v26, %s3990_s9 }
 0xa47   :  { %2881 = vrot.lane.b32.xlu0 %v2805_v26, %s3985_s23 }
 0xa4b   :  { %2887 = vrot.lane.b32.xlu0 %v2805_v26, %s3991_s3 }
 0xaa5   :  { %v2907_v8 = vpop.permute.xlu0 %2906  ;;  %v2880_v0 = vpop.permute.xlu1 %2879 }
 0xaa9   :  { %v2913_v33 = vpop.permute.xlu0 %2912 }
 0xaad   :  { %v2886_v34 = vpop.permute.xlu0 %2885 }
 0xab1   :  { %v2909_v41 = vpop.permute.xlu0 %2908 }
 0xab2   :  { %v2910_v49 = vsel %vm604_vm1, %v2907_v8, %v2909_v41  ;;  %v2911_v50 = vsel %vm604_vm1, %v2909_v41, %v2907_v8  ;;  %vm3029_vm1 = vcmp.lt.s32.totalorder %v4214_v15, 16  ;;  %v2846_v8 = vld [vmem:[%s5374_s18 + $0xf8] sm:$0xff] }
 0xab3   :  { %v2842_v41 = vld [vmem:[%s5374_s18 + $0xd8] sm:$0xff] }
 0xab5   :  { %v2915_v42 = vpop.permute.xlu0 %2914 }
 0xab6   :  { %v2917_v12 = vsel %vm2916_vm0, %v2913_v33, %v2915_v42  ;;  %v2918_v51 = vsel %vm2916_vm0, %v2915_v42, %v2913_v33  ;;  %v2845_v33 = vld [vmem:[%s5374_s18 + $0xf0] sm:$0xff]  ;;  %v2826_v42 = vld [vmem:[%s5374_s18 + $0x58] sm:$0xff] }
 0xab7   :  { %v2932_v22 = vsel %vm2930_vm3, %v2917_v12, %v2911_v50  ;;  %v2931_v62 = vsel %vm2929_vm4, %v2918_v51, %v2910_v49  ;;  %v2825_v49 = vld [vmem:[%s5374_s18 + $0x50] sm:$0xff]  ;;  %v2840_v50 = vld [vmem:[%s5374_s18 + $0xc8] sm:$0xff]  ;;  %v2839_v51 = vld [vmem:[%s5374_s18 + $0xc0] sm:$0xff] }
 0xab8   :  { %2968 = vmatprep.subr.mxu0 %v2932_v22  ;;  %v2824_v12 = vld [vmem:[%s5374_s18 + $0x48] sm:$0xff]  ;;  %v2823_v22 = vld [vmem:[%s5374_s18 + $0x40] sm:$0xff] }
 0xab9   :  { %2969 = vmatpush1.msra.mxu0 %v2931_v62  ;;  %v2882_v54 = vpop.permute.xlu0 %2881  ;;  %v2838_v62 = vld [vmem:[%s5374_s18 + $0xb8] sm:$0xff] }
 0xaba   :  { %2970 = vmatprep.subr.mxu0 %v2805_v26  ;;  %v2883_v1 = vsel %vm504_vm6, %v2880_v0, %v2882_v54  ;;  %v2884_v57 = vsel %vm504_vm6, %v2882_v54, %v2880_v0  ;;  %vm3038_vm6 = vcmp.lt.s32.totalorder %v4214_v15, 112  ;;  %v2811_v26 = vld [vmem:[%s5370_s14] sm:$0xff]  ;;  %v2821_v54 = vld [vmem:[%s5374_s18 + $0x30] sm:$0xff]  ;;  %v2836_v0 = vld [vmem:[%s5374_s18 + $0xa8] sm:$0xff] }
 0xabb   :  { %2971 = vmatpush1.msra.mxu0 %v2803_v25 }
 0xabd   :  { %v2888_v55 = vpop.permute.xlu0 %2887 }
 0xabe   :  { %v2890_v58 = vsel %vm2889_vm5, %v2886_v34, %v2888_v55  ;;  %v2891_v13 = vsel %vm2889_vm5, %v2888_v55, %v2886_v34  ;;  %v2829_v34 = vld [vmem:[%s5374_s18 + $0x70] sm:$0xff]  ;;  %v2820_v55 = vld [vmem:[%s5374_s18 + $0x28] sm:$0xff] }
 0xabf   :  { %v2905_v60 = vsel %vm2903_vm8, %v2891_v13, %v2883_v1  ;;  %v2904_v17 = vsel %vm2902_vm7, %v2890_v58, %v2884_v57  ;;  %v2810_v13 = vld [vmem:[%s5369_s13] sm:$0xff] }
 0xac0   :  { %2972 = vmatprep.subr.mxu0 %v2905_v60 }
 0xac1   :  { %2973 = vmatpush1.msra.mxu0 %v2904_v17  ;;  %v2835_v17 = vld [vmem:[%s5374_s18 + $0xa0] sm:$0xff] }
 0xac2   :  { %3648 = vmatmul.mubr.msk.f32.vlgmr.msra.gmra.mxu0 %vm688_vm10, %v2807_v14  ;;  %3804 = vmatprep.subr.mxu0 %v2846_v8 }
 0xac3   :  { %3012 = vmatprep.mubr.f32.mxu0 %v3984_v5  ;;  %3805 = vmatpush3.msra.mxu0 %v2830_v32 }
 0xac4   :  { %3806 = vmatprep.subr.mxu0 %v2845_v33 }
 0xac5   :  { %3807 = vmatpush3.msra.mxu0 %v2829_v34  ;;  %v2877_v34 = vld [vmem:[%s5375_s19 + $0xf0] sm:$0xff] }
 0xac6   :  { %3649 = vmatmul.mubr.msk.f32.gmra.mxu0 %vm688_vm10, %v2808_v61  ;;  %3808 = vmatprep.subr.mxu0 %v2844_v36  ;;  %v2819_v61 = vld [vmem:[%s5374_s18 + $0x20] sm:$0xff]  ;;  %v2861_v36 = vld [vmem:[%s5375_s19 + $0x70] sm:$0xff] }
 0xac7   :  { %3018 = vmatprep.mubr.f32.mxu0 %v3984_v5  ;;  %3809 = vmatpush3.msra.mxu0 %v2828_v37  ;;  %v2876_v37 = vld [vmem:[%s5375_s19 + $0xe8] sm:$0xff] }
 0xac8   :  { %3810 = vmatprep.subr.mxu0 %v2843_v39  ;;  %v2860_v39 = vld [vmem:[%s5375_s19 + $0x68] sm:$0xff] }
 0xac9   :  { %3811 = vmatpush3.msra.mxu0 %v2827_v40  ;;  %v2875_v40 = vld [vmem:[%s5375_s19 + $0xe0] sm:$0xff] }
 0xaca   :  { %3650 = vmatmul.mubr.msk.f32.gmra.mxu0 %vm688_vm10, %v2809_v46  ;;  %3812 = vmatprep.subr.mxu0 %v2842_v41  ;;  %v2834_v46 = vld [vmem:[%s5374_s18 + $0x98] sm:$0xff]  ;;  %v2859_v41 = vld [vmem:[%s5375_s19 + $0x60] sm:$0xff] }
 0xacb   :  { %3813 = vmatpush3.msra.mxu0 %v2826_v42  ;;  %v2874_v42 = vld [vmem:[%s5375_s19 + $0xd8] sm:$0xff] }
 0xacc   :  { %3814 = vmatprep.subr.mxu0 %v2841_v45  ;;  %v2858_v45 = vld [vmem:[%s5375_s19 + $0x58] sm:$0xff] }
 0xacd   :  { %3815 = vmatpush3.msra.mxu0 %v2825_v49  ;;  %v2873_v49 = vld [vmem:[%s5375_s19 + $0xd0] sm:$0xff] }
 0xace   :  { %3816 = vmatprep.subr.mxu0 %v2840_v50  ;;  %v2857_v50 = vld [vmem:[%s5375_s19 + $0x50] sm:$0xff] }
 0xacf   :  { %3817 = vmatpush3.msra.mxu0 %v2824_v12  ;;  %v2872_v12 = vld [vmem:[%s5375_s19 + $0xc8] sm:$0xff] }
 0xad0   :  { %3818 = vmatprep.subr.mxu0 %v2839_v51  ;;  %v2856_v51 = vld [vmem:[%s5375_s19 + $0x48] sm:$0xff] }
 0xad1   :  { %3819 = vmatpush3.msra.mxu0 %v2823_v22  ;;  %v2871_v22 = vld [vmem:[%s5375_s19 + $0xc0] sm:$0xff] }
 0xad2   :  { %3820 = vmatprep.subr.mxu0 %v2838_v62  ;;  %v2855_v62 = vld [vmem:[%s5375_s19 + $0x40] sm:$0xff] }
 0xad3   :  { %3821 = vmatpush3.msra.mxu0 %v2822_v35  ;;  %v2870_v35 = vld [vmem:[%s5375_s19 + $0xb8] sm:$0xff] }
 0xad4   :  { %3822 = vmatprep.subr.mxu0 %v2837_v63  ;;  %v2854_v63 = vld [vmem:[%s5375_s19 + $0x38] sm:$0xff] }
 0xad5   :  { %3823 = vmatpush3.msra.mxu0 %v2821_v54  ;;  %v2869_v54 = vld [vmem:[%s5375_s19 + $0xb0] sm:$0xff] }
 0xad6   :  { %3824 = vmatprep.subr.mxu0 %v2836_v0  ;;  %v2853_v0 = vld [vmem:[%s5375_s19 + $0x30] sm:$0xff] }
 0xad7   :  { %3825 = vmatpush3.msra.mxu0 %v2820_v55  ;;  %v2868_v55 = vld [vmem:[%s5375_s19 + $0xa8] sm:$0xff] }
 0xad8   :  { %3826 = vmatprep.subr.mxu0 %v2835_v17  ;;  %v2865_v17 = vld [vmem:[%s5375_s19 + $0x90] sm:$0xff] }
 0xad9   :  { %3827 = vmatpush3.msra.mxu0 %v2819_v61  ;;  %v2864_v61 = vld [vmem:[%s5375_s19 + $0x88] sm:$0xff] }
 0xada   :  { %3828 = vmatprep.subr.mxu0 %v2834_v46  ;;  %v2848_v46 = vld [vmem:[%s5375_s19 + $0x8] sm:$0xff] }
 0xb82   :  { %v3008_v29 = vpop.f32.mrf.mxu0 }
 0xb83   :  { %3025 = vrot.lane.b32.xlu0 %v3008_v29, %s3980_s2  ;;  %v2818_v29 = vld [vmem:[%s5374_s18 + $0x18] sm:$0xff] }
 0xb84   :  { %v3010_v3 = vpop.f32.mrf.mxu0  ;;  %3829 = vmatpush3.msra.mxu0 %v2818_v29  ;;  %v2863_v29 = vld [vmem:[%s5375_s19 + $0x80] sm:$0xff] }
 0xb85   :  { %3027 = vrot.lane.b32.xlu1 %v3010_v3, %s3980_s2  ;;  %v2833_v3 = vld [vmem:[%s5374_s18 + $0x90] sm:$0xff] }
 0xb86   :  { %v3014_v38 = vpop.f32.mrf.mxu0  ;;  %3830 = vmatprep.subr.mxu0 %v2833_v3  ;;  %v2847_v3 = vld [vmem:[%s5375_s19] sm:$0xff] }
 0xb88   :  { %v3016_v27 = vpop.f32.mrf.mxu0 }
 0xb8a   :  { %v3020_v28 = vpop.f32.mrf.mxu0 }
 0xb8b   :  { %3034 = vrot.lane.b32.xlu0 %v3020_v28, %s3992_s5  ;;  %v2816_v28 = vld [vmem:[%s5374_s18 + $0x8] sm:$0xff] }
 0xb8c   :  { %v3022_v10 = vpop.f32.mrf.mxu0 }
 0xb8d   :  { %3036 = vrot.lane.b32.xlu1 %v3022_v10, %s3992_s5  ;;  %v2831_v10 = vld [vmem:[%s5374_s18 + $0x80] sm:$0xff] }
 0xbf5   :  { %v3026_v52 = vpop.permute.xlu0 %3025 }
 0xbf7   :  { %v3028_v11 = vpop.permute.xlu1 %3027 }
 0xbf8   :  { %v3030_v56 = vsel %vm3029_vm1, %v3026_v52, %v3028_v11  ;;  %v3031_v18 = vsel %vm3029_vm1, %v3028_v11, %v3026_v52  ;;  %v2815_v11 = vld [vmem:[%s5374_s18] sm:$0xff] }
 0xbf9   :  { %v3032_v19 = vadd.f32 %v3031_v18, %v3014_v38  ;;  %v3033_v48 = vadd.f32 %v3030_v56, %v3016_v27  ;;  %v2817_v38 = vld [vmem:[%s5374_s18 + $0x10] sm:$0xff]  ;;  %v2832_v27 = vld [vmem:[%s5374_s18 + $0x88] sm:$0xff] }
 0xbfa   :  { %3831 = vmatpush3.msra.mxu0 %v2817_v38 }
 0xbfb   :  { %3832 = vmatprep.subr.mxu0 %v2832_v27 }
 0xbfc   :  { %3833 = vmatpush3.msra.mxu0 %v2816_v28 }
 0xbfd   :  { %v3035_v43 = vpop.permute.xlu0 %3034  ;;  %3834 = vmatprep.subr.mxu0 %v2831_v10 }
 0xbfe   :  { %3835 = vmatpush3.msra.mxu0 %v2815_v11 }
 0xbff   :  { %v3037_v9 = vpop.permute.xlu1 %3036 }
 0xc00   :  { %v3039_v20 = vsel %vm3038_vm6, %v3035_v43, %v3037_v9  ;;  %v3040_v4 = vsel %vm3038_vm6, %v3037_v9, %v3035_v43 }
 0xc01   :  { %v3041_v7 = vadd.f32 %v3039_v20, %v3032_v19  ;;  %v3042_v44 = vadd.f32 %v3040_v4, %v3033_v48 }
 0xc03   :  { %3073 = vmatprep.subr.mxu1 %v3042_v44 }
 0xc04   :  { %3074 = vmatpush1.msra.mxu1 %v3041_v7 }
 0xc05   :  { %3651 = vmatmul.mubr.msk.f32.vlgmr.msra.gmra.mxu1 %vm1096_vm12, %v3931_v47 }
 0xc06   :  { %3186 = vmatprep.mubr.f32.mxu1 %v3984_v5 }
 0xcc5   :  { %v3109_v16 = vpop.f32.mrf.mxu1 }
 0xcc7   :  { %v3111_v15 = vpop.f32.mrf.mxu1 }
 0xcc8   :  { %v3114_v21 = vadd.f32 %v3111_v15, %v3109_v16 }
 0xcca   :  { %3115 = vadd.xlane.f32.xlu0 %v3114_v21 }
 0xd53   :  { %v3116_v53 = vpop.xlane.xlu0 %3115 }
 0xd54   :  { %v3117_v24 = vmul.f32 0.001953125, %v3116_v53  ;;  %v3932_v53 = vld [vmem:[%s5390_s6] sm:$0xff] }
 0xd56   :  { %v5110_v30 = vsub.f32 %v3041_v7, %v3117_v24  ;;  %v5112_v23 = vsub.f32 %v3042_v44, %v3117_v24  ;;  %v3933_v24 = vld [vmem:[%s5391_s21] sm:$0xf] }
 0xd58   :  { %v3120_v25 = vmul.f32 %v5110_v30, %v5110_v30  ;;  %v3121_v31 = vmul.f32 %v5112_v23, %v5112_v23 }
 0xd5a   :  { %3152 = vmatprep.subr.mxu1 %v3121_v31 }
 0xd5b   :  { %3153 = vmatpush1.msra.mxu1 %v3120_v25 }
 0xd5c   :  { %3652 = vmatmul.mubr.msk.f32.vlgmr.msra.gmra.mxu1 %vm1096_vm12, %v3931_v47  ;;  %3888 = vmatprep.subr.mxu1 %v3984_v5 }
 0xd5d   :  { %3890 = vmatprep.mubr.msk.f32.mxu1 %vm3989_vm9, %v3984_v5 }
 0xe1c   :  { %v3188_v2 = vpop.f32.mrf.mxu1 }
 0xe1e   :  { %v3190_v59 = vpop.f32.mrf.mxu1 }
 0xe1f   :  { %v3193_v6 = vadd.f32 %v3190_v59, %v3188_v2  ;;  %v2814_v59 = vld [vmem:[%s5373_s17] sm:$0xff] }
 0xe21   :  { %3194 = vadd.xlane.f32.xlu1 %v3193_v6  ;;  %v3444_v6 = vcombine.high %v2814_v59, %v2814_v59 }
 0xe32   :  { %3209 = vperm.xlu1 %3921, %v2811_v26   ;;  %v2878_v26 = vld [vmem:[%s5375_s19 + $0xf8] sm:$0xff] }
 0xeaa   :  { %v3195_v1 = vpop.xlane.xlu1 %3194 }
 0xeab   :  { %v3196_v57 = vmul.f32 0.001953125, %v3195_v1  ;;  %v2852_v1 = vld [vmem:[%s5375_s19 + $0x28] sm:$0xff] }
 0xead   :  { %v3197_v58 = vadd.f32 1e-05, %v3196_v57  ;;  %v2867_v57 = vld [vmem:[%s5375_s19 + $0xa0] sm:$0xff] }
 0xeae   :  { %v3210_v19 = vpop.permute.xlu1 %3209 }
 0xeaf   :  { %3929 = vrsqrt.f32 %v3197_v58  ;;  %v2851_v58 = vld [vmem:[%s5375_s19 + $0x20] sm:$0xff] }
 0xebc   :  { %v3930_v60 = vpop.eup %3929 }
 0xebd   :  { %v3199_v14 = vmul.f32 %v3930_v60, %v2810_v13  ;;  %v2866_v13 = vld [vmem:[%s5375_s19 + $0x98] sm:$0xff] }
 0xebe   :  { %v2850_v60 = vld [vmem:[%s5375_s19 + $0x18] sm:$0xff] }
 0xebf   :  { %3202 = vperm.xlu0 %3920, %v3199_v14   ;;  %v2849_v14 = vld [vmem:[%s5375_s19 + $0x10] sm:$0xff] }
 0xf3a   :  { %v3203_v52 = vpop.permute.xlu0 %3202 }
 0xf3b   :  { %v3205_v56 = vmul.f32 %v3203_v52, %v5110_v30  ;;  %v3206_v18 = vmul.f32 %v3203_v52, %v5112_v23 }
 0xf3d   :  { %v3212_v48 = vadd.f32 %v3210_v19, %v3205_v56  ;;  %v3213_v43 = vadd.f32 %v3210_v19, %v3206_v18 }
 0xf3f   :  { %vm3214_vm10 = vcmp.gt.f32.partialorder %v3212_v48, 0.0  ;;  %v3216_v9 = vmul.f32 0.1, %v3212_v48  ;;  %v3217_v20 = vmul.f32 0.1, %v3213_v43  ;;  %vm3215_vm13 = vcmp.gt.f32.partialorder %v3213_v43, 0.0 }
 0xf41   :  { %v5226_v4 = vsel %vm3214_vm10, %v3212_v48, %v3216_v9  ;;  %v5228_v7 = vsel %vm3215_vm13, %v3213_v43, %v3217_v20 }
 0xf42   :  { %v3220_v44 = vmul.f32 %v5226_v4, %v5226_v4  ;;  %v3221_v47 = vmul.f32 %v5228_v7, %v5228_v7 }
 0xf44   :  { %3286 = vmatprep.mubr.f32.mxu0 %v3221_v47 }
 0xf45   :  { %3287 = vmatmul.mubr.f32.vlgmr.msra.gmra.mxu0 %v3220_v44 }
0x1005   :  { %v3836_v16 = vpop.f32.mrf.mxu0 }
0x1007   :  { %v3837_v15 = vpop.f32.mrf.mxu0 }
0x1008   :  { %v3838_v21 = vadd.f32 %v3837_v15, %v3836_v16 }
0x100a   :  { %3889 = vmatpush3.msra.mxu1 %v3838_v21 }
0x100b   :  { %3891 = vmatmul.mubr.msk.f32.vlgmr.msra.gmra.mxu1 %vm1096_vm12, %v3932_v53  ;;  %3893 = vmatprep.subr.mxu1 %v3984_v5 }
0x100c   :  { %3894 = vmatpush3.msk.msra.mxu1 %vm2128_vm2, %v3933_v24  ;;  %3895 = vmatprep.mubr.msk.f32.mxu1 %vm3989_vm9, %v3984_v5  ;;  %vm3595_vm9 = vcmask 523264  }
0x100d   :  { %3657 = vmatprep.subr.msk.mxu1 %vm2128_vm2, %v3444_v6 }
0x10cb   :  { %v3358_v30 = vpop.f32.mrf.mxu1 }
0x10cc   :  { %v3362_v23 = vsel %vm2118_vm11, %v3358_v30, -inf }
0x10cd   :  { %3363 = vmax.xlane.f32.xlu0 %v3362_v23  ;;  %v3892_v25 = vpop.f32.mrf.mxu1 }
0x1156   :  { %v3364_v31 = vpop.xlane.xlu0 %3363 }
0x1157   :  { %vm3365_vm14 = vcmp.ge.f32.partialorder %v3358_v30, %v3364_v31 }
0x1158   :  { %v3654_v2 = vsel %vm3365_vm14, 1.0, %v3984_v5 }
0x1159   :  { %3896 = vmatmul.mubr.msk.f32.vlgmr.msra.gmra.mxu1 %vm2118_vm11, %v3654_v2 }
0x115a   :  { %3516 = vmatprep.mubr.f32.mxu1 %v3984_v5  ;;  %3658 = vmatpush1.msk.msra.mxu1 %vm2128_vm2, %v2814_v59  ;;  %v2862_v5 = vld [vmem:[%s5375_s19 + $0x78] sm:$0xff]  ;;  %s3954_s19 = scalar_lea.vmem %s3604_s8, 128 }
0x115b   :  { %3843 = vmatprep.subr.mxu1 %v2878_v26  ;;  %p3955_p5 = scmp.ne.s32.totalorder %s3604_s8, %s3954_s19  ;;  %p3960_p7 = scmp.lt.s32.totalorder %s3954_s19, %s3954_s19 }
0x115d   :  { %p3961_p8 = por %p3960_p7, %p3959_p6 }
0x115f   :  { %p3962_p9 = pnand %p3961_p8, %p3955_p5 }
0x1219   :  { %v3437_v8 = vpop.f32.mrf.mxu1 }
0x121a   :  { %vm3441_vm12 = vcmp.lt.f32.partialorder %v3437_v8, 0.5 }
0x121b   :  { %v3442_v32 = vsel %vm3441_vm12, %v3654_v2, 0.0  ;;  %v3897_v33 = vpop.f32.mrf.mxu1 }
0x121c   :  { %3659 = vmatmul.mubr.msk.f32.vlgmr.msra.gmra.mxu1 %vm2118_vm11, %v3442_v32 }
0x121d   :  { %3844 = vmatpush3.msra.mxu1 %v2862_v5 }
0x121e   :  { %3845 = vmatprep.subr.mxu1 %v2877_v34 }
0x121f   :  { %3846 = vmatpush3.msra.mxu1 %v2861_v36 }
0x1220   :  { %3847 = vmatprep.subr.mxu1 %v2876_v37 }
0x1221   :  { %3848 = vmatpush3.msra.mxu1 %v2860_v39 }
0x1222   :  { %3849 = vmatprep.subr.mxu1 %v2875_v40 }
0x1223   :  { %3850 = vmatpush3.msra.mxu1 %v2859_v41 }
0x1224   :  { %3851 = vmatprep.subr.mxu1 %v2874_v42 }
0x1225   :  { %3852 = vmatpush3.msra.mxu1 %v2858_v45 }
0x1226   :  { %3853 = vmatprep.subr.mxu1 %v2873_v49 }
0x1227   :  { %3854 = vmatpush3.msra.mxu1 %v2857_v50 }
0x1228   :  { %3855 = vmatprep.subr.mxu1 %v2872_v12 }
0x1229   :  { %3856 = vmatpush3.msra.mxu1 %v2856_v51 }
0x122a   :  { %3857 = vmatprep.subr.mxu1 %v2871_v22 }
0x122b   :  { %3858 = vmatpush3.msra.mxu1 %v2855_v62 }
0x122c   :  { %3859 = vmatprep.subr.mxu1 %v2870_v35 }
0x122d   :  { %3860 = vmatpush3.msra.mxu1 %v2854_v63 }
0x122e   :  { %3861 = vmatprep.subr.mxu1 %v2869_v54 }
0x122f   :  { %3862 = vmatpush3.msra.mxu1 %v2853_v0 }
0x1230   :  { %3863 = vmatprep.subr.mxu1 %v2868_v55 }
0x1231   :  { %3864 = vmatpush3.msra.mxu1 %v2852_v1 }
0x1232   :  { %3865 = vmatprep.subr.mxu1 %v2867_v57 }
0x1233   :  { %3866 = vmatpush3.msra.mxu1 %v2851_v58 }
0x1234   :  { %3867 = vmatprep.subr.mxu1 %v2866_v13 }
0x1235   :  { %3868 = vmatpush3.msra.mxu1 %v2850_v60 }
0x1236   :  { %3869 = vmatprep.subr.mxu1 %v2865_v17 }
0x1237   :  { %3870 = vmatpush3.msra.mxu1 %v2849_v14 }
0x1238   :  { %3871 = vmatprep.subr.mxu1 %v2864_v61 }
0x1239   :  { %3872 = vmatpush3.msra.mxu1 %v2848_v46 }
0x123a   :  { %3873 = vmatprep.subr.mxu1 %v2863_v29 }
0x123b   :  { %3874 = vmatpush3.msra.mxu1 %v2847_v3 }
0x12dc   :  { %v3518_v38 = vpop.f32.mrf.mxu1 }
0x12dd   :  { %v3523_v10 = vmul.f32 %v3518_v38, %v5226_v4 }
0x12de   :  { %v3520_v27 = vpop.f32.mrf.mxu1 }
0x12df   :  { %v3524_v28 = vmul.f32 %v3520_v27, %v5228_v7 }
0x12e1   :  { %3589 = vmatprep.mubr.f32.mxu1 %v3524_v28 }
0x12e2   :  { %3590 = vmatmul.mubr.f32.vlgmr.msra.gmra.mxu1 %v3523_v10 }
0x13a2   :  { %v3875_v11 = vpop.f32.mrf.mxu1 }
0x13a4   :  { %v3876_v52 = vpop.f32.mrf.mxu1 }
0x13a5   :  { %v3877_v56 = vadd.f32 %v3876_v52, %v3875_v11 }
0x13a7   :  { %3596 = vst.msk [vmem:[#allocation5] sm:$0xff] %vm3595_vm9, %v3877_v56 }
0x13a8   :  { %3965 = shalt.err (!%p3962_p9)
}
0x13a9   :  { %3606 = dma.vmem_to_hbm [thread:$0]  %s3604_s8, 128, %s5376_s20, [#allocation4]  }
0x13aa   :  { %3976 = dma.done.wait [#allocation4], 128  }
0x13ab   :  { %3977 = vsyncadd [#allocation4], 4294967168 }
0x13ac   :  { %3610 = vsyncpa [#allocation3], 1 }
0x13ad   :  { %3611 = vsyncpa [#allocation4], 1 }

</bundles_post_ra>
